<compile_context>
chip_gen: v5e
topology: v5e:2x2
jax: 0.10.0
libtpu: 0.0.40
codegen_flags: <defaults>
</compile_context>

<pallas_src>
import functools

import jax
import jax.numpy as jnp
import numpy as np
from jax.experimental import pallas as pl
from jax.experimental.pallas import tpu as pltpu


def _round_up(x, n):
    return ((x + n - 1) // n) * n


def _soft_threshold(x, t):
    # self_active(x, t) = relu(x - t) - relu(-x - t)
    return jnp.maximum(x - t, 0.0) - jnp.maximum(-x - t, 0.0)


def _dladmm_kernel(wgroup_ref,                       # scalar prefetch (used by W index_map)
                   beta1_ref, beta2_ref, beta3_ref,  # scalar prefetch, SMEM
                   ss1_ref, ss2_ref, ap_ref, ap1_ref,
                   A_ref, W_ref, X_ref, Z0_ref, E0_ref, L0_ref,   # VMEM inputs
                   Zout_ref, Eout_ref, Lout_ref,                  # VMEM outputs
                   Zc, Ec, Lc,                                    # VMEM scratch carry
                   *, compute_dtype):
    del wgroup_ref                       # only consumed by W's index_map
    k = pl.program_id(1)                 # layer index (innermost, "arbitrary")
    km1 = jnp.maximum(k - 1, 0)          # clamped index for the E/L update params
    upd = (k > 0).astype(jnp.float32)    # 0.0 at the first layer, 1.0 afterwards

    # (Re)initialize the carried state at the first layer of each batch tile.
    @pl.when(k == 0)
    def _init():
        Zc[...] = Z0_ref[...]
        Ec[...] = E0_ref[...]
        Lc[...] = L0_ref[...]

    A = A_ref[...]                # (m, d)   matmul dtype (bf16 by default)
    W = W_ref[0]                  # (d, m)   tied group picked by the index_map
    X = X_ref[...]                # (m, bt)  f32
    Z = Zc[...]                   # (d, bt)  f32 carry
    E = Ec[...]                   # (m, bt)
    L = Lc[...]                   # (m, bt)

    # Hoisted common subexpression A@Z - X, shared by the E/L and Z updates.
    AZmX = jnp.dot(A, Z.astype(compute_dtype),
                   preferred_element_type=jnp.float32) - X        # (m, bt) f32

    # Flattened (select-based) E/L update: computed unconditionally and blended
    # with `upd`, so there is no scf.if basic-block boundary and no VMEM
    # store->load round trip in the hot path.  At k == 0 the blend keeps
    # E = E0 and L = L0, matching the PyTorch module.
    VVar = L + beta2_ref[km1] * (AZmX + E)
    E_upd = _soft_threshold(E - ss2_ref[km1] * VVar, ap1_ref[km1])
    E_new = E + upd * (E_upd - E)
    L_new = L + upd * (beta3_ref[km1] * (AZmX + E_new))

    Tn = AZmX + E_new
    Varn = L_new + beta1_ref[k] * Tn
    WV = jnp.dot(W, Varn.astype(compute_dtype),
                 preferred_element_type=jnp.float32)              # (d, bt) f32
    Z_new = _soft_threshold(Z - ss1_ref[k] * WV, ap_ref[k])

    Zc[...] = Z_new
    Ec[...] = E_new
    Lc[...] = L_new
    Zout_ref[0] = Z_new
    Eout_ref[0] = E_new
    Lout_ref[0] = L_new


def _block_spec(block_shape, index_map, *, buffers=None):
    """BlockSpec with an optional explicit buffer count.

    Falls back to the default (double-buffered) spec if this jax version does
    not expose pipeline_mode= / pl.Buffered on BlockSpec.
    """
    if buffers is not None and hasattr(pl, "Buffered"):
        try:
            return pl.BlockSpec(block_shape, index_map,
                                pipeline_mode=pl.Buffered(buffer_count=buffers))
        except TypeError:
            pass
    return pl.BlockSpec(block_shape, index_map)


def dladmm_forward(params, A, W, X, Z0, E0, L0, *, K, interval,
                   b_tile=None, max_b_tile=1024, min_grid_b=1,
                   matmul_dtype=jnp.bfloat16, vmem_limit_bytes=None):
    """Pallas implementation of DLADMMNet.forward(x, K) -> (Z_all, E_all, L_all).

    params: dict of (layers,) f32 vectors: beta1, beta2, beta3, ss1, ss2,
            active_para, active_para1.
    Returns stacked (K, d, B), (K, m, B), (K, m, B) float32 arrays.

    b_tile (multiple of 128) is the primary perf knob.  Set min_grid_b=2 on
    v7x so the "parallel" batch axis keeps work for both TensorCores.
    matmul_dtype=bf16 only affects the MXU operands (f32 accumulation); all
    elementwise math stays f32.
    """
    m, d = A.shape
    B = X.shape[1]
    layers = int(jnp.asarray(params["beta1"]).reshape(-1).shape[0])
    K = min(K, layers)
    f32 = jnp.float32

    # ---- batch tiling (primary tuning knob) --------------------------------
    if b_tile is None:
        Bp0 = _round_up(B, 128)
        b_tile = min(max_b_tile, Bp0)
        if min_grid_b > 1:  # keep >= min_grid_b tiles (v7x: 2 TensorCores)
            b_tile = min(b_tile, max(128, ((Bp0 // min_grid_b) // 128) * 128))
    assert b_tile % 128 == 0, "batch tile must be lane-dense (multiple of 128)"
    Bp = _round_up(B, b_tile)
    grid_b = Bp // b_tile

    if Bp != B:
        pad = ((0, 0), (0, Bp - B))
        X = jnp.pad(X, pad)
        Z0 = jnp.pad(Z0, pad)
        E0 = jnp.pad(E0, pad)
        L0 = jnp.pad(L0, pad)

    # MXU operands in matmul_dtype; everything else stays f32.
    A_mm = A.astype(matmul_dtype)
    W_mm = W.astype(matmul_dtype)
    X = X.astype(f32)
    Z0 = Z0.astype(f32)
    E0 = E0.astype(f32)
    L0 = L0.astype(f32)

    # Scalar-prefetch table mapping layer k -> tied fc weight group.
    wgroup = jnp.asarray(np.arange(K) // interval, dtype=jnp.int32)
    scal = lambda name: jnp.asarray(params[name], f32).reshape(-1)

    in_specs = [
        # A / Z0 / E0 / L0 never change along the K axis (A never changes at
        # all): single-buffer them so the VMEM budget buys a larger b_tile.
        _block_spec((m, d), lambda b, k, *_: (0, 0), buffers=1),                # A
        pl.BlockSpec((1, d, m), lambda b, k, wg, *_: (wg[k], 0, 0)),            # W (tied)
        pl.BlockSpec((m, b_tile), lambda b, k, *_: (0, b)),                     # X
        _block_spec((d, b_tile), lambda b, k, *_: (0, b), buffers=1),           # Z0
        _block_spec((m, b_tile), lambda b, k, *_: (0, b), buffers=1),           # E0
        _block_spec((m, b_tile), lambda b, k, *_: (0, b), buffers=1),           # L0
    ]
    out_specs = (
        pl.BlockSpec((1, d, b_tile), lambda b, k, *_: (k, 0, b)),               # Z_all
        pl.BlockSpec((1, m, b_tile), lambda b, k, *_: (k, 0, b)),               # E_all
        pl.BlockSpec((1, m, b_tile), lambda b, k, *_: (k, 0, b)),               # L_all
    )

    grid_spec = pltpu.PrefetchScalarGridSpec(
        num_scalar_prefetch=8,            # wgroup + 7 per-layer scalar params
        grid=(grid_b, K),
        in_specs=in_specs,
        out_specs=out_specs,
        scratch_shapes=[
            pltpu.VMEM((d, b_tile), f32),    # Z carry
            pltpu.VMEM((m, b_tile), f32),    # E carry
            pltpu.VMEM((m, b_tile), f32),    # L carry
        ],
    )

    # VMEM budget: single-buffered Z0/E0/L0 + double-buffered X + carries +
    # double-buffered output slabs (A/W are tiny).  Raise the scoped limit only
    # when the estimate approaches v5e's 16 MiB default; on v7x (64 MiB
    # physical) size b_tile so this stays <= ~24-28 MiB.
    est = 4 * b_tile * ((d + 2 * m)          # Z0/E0/L0 single-buffered
                        + 2 * m              # X double-buffered
                        + (d + 2 * m)        # carries
                        + 2 * (d + 2 * m))   # outputs double-buffered
    est += 4 * (m * d + 2 * d * m) + (1 << 20)
    if vmem_limit_bytes is None and est > (12 << 20):
        vmem_limit_bytes = min(2 * est, 96 << 20)

    cost = pl.CostEstimate(
        flops=4 * m * d * Bp * K,                               # 2 matmuls / step
        transcendentals=0,
        bytes_accessed=4 * Bp * ((3 * m + d) + K * (2 * m + d)))

    out_shape = (
        jax.ShapeDtypeStruct((K, d, Bp), f32),
        jax.ShapeDtypeStruct((K, m, Bp), f32),
        jax.ShapeDtypeStruct((K, m, Bp), f32),
    )

    Z_all, E_all, L_all = pl.pallas_call(
        functools.partial(_dladmm_kernel, compute_dtype=matmul_dtype),
        out_shape=out_shape,
        grid_spec=grid_spec,
        compiler_params=pltpu.CompilerParams(
            dimension_semantics=("parallel", "arbitrary"),
            vmem_limit_bytes=vmem_limit_bytes),
        cost_estimate=cost,
    )(wgroup,
      scal("beta1"), scal("beta2"), scal("beta3"),
      scal("ss1"), scal("ss2"),
      scal("active_para"), scal("active_para1"),
      A_mm, W_mm, X, Z0, E0, L0)

    if Bp != B:
        Z_all = Z_all[:, :, :B]
        E_all = E_all[:, :, :B]
        L_all = L_all[:, :, :B]
    return Z_all, E_all, L_all


def dladmm_reference(params, A, W, X, Z0, E0, L0, *, K, interval):
    """Pure-JAX reference mirroring the PyTorch forward (all f32)."""
    Z, E, L = Z0, E0, L0
    Zs, Es, Ls = [], [], []
    for k in range(K):
        Wk = W[k // interval]
        if k == 0:
            Tn = A @ Z + E - X
            Varn = L + params["beta1"][k] * Tn
            Z = _soft_threshold(Z - params["ss1"][k] * (Wk @ Varn),
                                params["active_para"][k])
        else:
            AZ = A @ Z
            VVar = L + params["beta2"][k - 1] * (AZ + E - X)
            E = _soft_threshold(E - params["ss2"][k - 1] * VVar,
                                params["active_para1"][k - 1])
            Tn = AZ + E - X
            L = L + params["beta3"][k - 1] * Tn
            Varn = L + params["beta1"][k] * Tn
            Z = _soft_threshold(Z - params["ss1"][k] * (Wk @ Varn),
                                params["active_para"][k])
        Zs.append(Z); Es.append(E); Ls.append(L)
    return jnp.stack(Zs), jnp.stack(Es), jnp.stack(Ls)


if __name__ == "__main__":
    # Small shapes consistent with the module; B is a non-multiple of 128 so
    # both the lane padding and the multi-tile (grid_b=2) batch grid are hit.
    m, d, B = 32, 16, 1000
    layers, interval = 6, 3
    K = layers
    num_fc = layers // interval

    key = jax.random.PRNGKey(0)
    kA, kW, kX, kZ, kE, kL = jax.random.split(key, 6)

    A = jax.random.normal(kA, (m, d), dtype=jnp.float32) / jnp.sqrt(m)
    X = jax.random.normal(kX, (m, B), dtype=jnp.float32)
    Z0 = jax.random.normal(kZ, (d, B), dtype=jnp.float32) * 0.1
    E0 = jax.random.normal(kE, (m, B), dtype=jnp.float32) * 0.1
    L0 = jax.random.normal(kL, (m, B), dtype=jnp.float32) * 0.1

    # fc weights: (A.T + 0.001 * randn_like(A.T)) * 0.4, one per layer group.
    W = (A.T[None, :, :]
         + 0.001 * jax.random.normal(kW, (num_fc, d, m), dtype=jnp.float32)) * 0.4

    params = {
        "beta1": jnp.ones((layers,), jnp.float32),
        "beta2": jnp.ones((layers,), jnp.float32),
        "beta3": jnp.ones((layers,), jnp.float32),
        "ss1": jnp.ones((layers,), jnp.float32),
        "ss2": jnp.ones((layers,), jnp.float32),
        "active_para": 0.01 * jnp.ones((layers,), jnp.float32),
        "active_para1": 0.01 * jnp.ones((layers,), jnp.float32),
    }

    Zr, Er, Lr = dladmm_reference(params, A, W, X, Z0, E0, L0,
                                  K=K, interval=interval)

    # Default fast path: enlarged lane-dense batch tile + bf16 MXU operands.
    Z_all, E_all, L_all = dladmm_forward(params, A, W, X, Z0, E0, L0,
                                         K=K, interval=interval, b_tile=512)
    jax.block_until_ready((Z_all, E_all, L_all))

    assert Z_all.shape == (K, d, B)
    assert E_all.shape == (K, m, B)
    assert L_all.shape == (K, m, B)
    assert bool(jnp.all(jnp.isfinite(Z_all)))
    assert bool(jnp.all(jnp.isfinite(E_all)))
    assert bool(jnp.all(jnp.isfinite(L_all)))

    def _max_err(a, b):
        return float(jnp.max(jnp.abs(a - b)))

    # bf16 MXU operands (f32 accumulation / f32 elementwise): scale-aware tol.
    for got, ref in ((Z_all, Zr), (E_all, Er), (L_all, Lr)):
        tol = 5e-2 * (1.0 + float(jnp.max(jnp.abs(ref))))
        err = _max_err(got, ref)
        assert err < tol, (err, tol)

    # Exact-semantics check: full-f32 matmul path matches the reference tightly.
    Zf, Ef, Lf = dladmm_forward(params, A, W, X, Z0, E0, L0,
                                K=K, interval=interval, b_tile=512,
                                matmul_dtype=jnp.float32)
    jax.block_until_ready((Zf, Ef, Lf))
    for got, ref in ((Zf, Zr), (Ef, Er), (Lf, Lr)):
        err = _max_err(got, ref)
        assert err < 5e-2, err

    print("KERNEL_OK")
</pallas_src>

<mosaic_0001>
module attributes {stable_mosaic.version = 11 : i64} {
  func.func @_dladmm_kernel(%arg0: i32, %arg1: i32, %arg2: memref<6xi32, #tpu.memory_space<smem>>, %arg3: memref<6xf32, #tpu.memory_space<smem>>, %arg4: memref<6xf32, #tpu.memory_space<smem>>, %arg5: memref<6xf32, #tpu.memory_space<smem>>, %arg6: memref<6xf32, #tpu.memory_space<smem>>, %arg7: memref<6xf32, #tpu.memory_space<smem>>, %arg8: memref<6xf32, #tpu.memory_space<smem>>, %arg9: memref<6xf32, #tpu.memory_space<smem>>, %arg10: memref<32x16xbf16, #tpu.memory_space<vmem>>, %arg11: memref<1x16x32xbf16, #tpu.memory_space<vmem>>, %arg12: memref<32x512xf32, #tpu.memory_space<vmem>>, %arg13: memref<16x512xf32, #tpu.memory_space<vmem>>, %arg14: memref<32x512xf32, #tpu.memory_space<vmem>>, %arg15: memref<32x512xf32, #tpu.memory_space<vmem>>, %arg16: memref<1x16x512xf32, #tpu.memory_space<vmem>>, %arg17: memref<1x32x512xf32, #tpu.memory_space<vmem>>, %arg18: memref<1x32x512xf32, #tpu.memory_space<vmem>>, %arg19: memref<16x512xf32, #tpu.memory_space<vmem>>, %arg20: memref<32x512xf32, #tpu.memory_space<vmem>>, %arg21: memref<32x512xf32, #tpu.memory_space<vmem>>) attributes {dimension_semantics = [#tpu.dimension_semantics<parallel>, #tpu.dimension_semantics<arbitrary>], iteration_bounds = array<i64: 2, 6>, scalar_prefetch = 8 : i64, scratch_operands = 3 : i64, tpu.core_type = #tpu.core_type<tc>, window_params = [{pipeline_mode = #tpu.pipeline_mode<synchronous>, transform_indices = @transform_0, window_bounds = array<i64: 32, 16>}, {transform_indices = @transform_1, window_bounds = array<i64: 1, 16, 32>}, {transform_indices = @transform_2, window_bounds = array<i64: 32, 512>}, {pipeline_mode = #tpu.pipeline_mode<synchronous>, transform_indices = @transform_3, window_bounds = array<i64: 16, 512>}, {pipeline_mode = #tpu.pipeline_mode<synchronous>, transform_indices = @transform_4, window_bounds = array<i64: 32, 512>}, {pipeline_mode = #tpu.pipeline_mode<synchronous>, transform_indices = @transform_5, window_bounds = array<i64: 32, 512>}, {transform_indices = @transform_6, window_bounds = array<i64: 1, 16, 512>}, {transform_indices = @transform_7, window_bounds = array<i64: 1, 32, 512>}, {transform_indices = @transform_8, window_bounds = array<i64: 1, 32, 512>}]} {
    %c1_i32 = arith.constant 1 : i32
    %0 = arith.subi %arg1, %c1_i32 : i32
    %c0_i32 = arith.constant 0 : i32
    %1 = arith.maxsi %0, %c0_i32 : i32
    %c0_i32_0 = arith.constant 0 : i32
    %2 = arith.cmpi sgt, %arg1, %c0_i32_0 : i32
    %3 = arith.extui %2 : i1 to i32
    %4 = arith.sitofp %3 : i32 to f32
    %c0_i32_1 = arith.constant 0 : i32
    %5 = arith.cmpi eq, %arg1, %c0_i32_1 : i32
    %6 = arith.extui %5 : i1 to i32
    %c0_i32_2 = arith.constant 0 : i32
    %7 = arith.cmpi ne, %6, %c0_i32_2 : i32
    scf.if %7 {
      %c0_37 = arith.constant 0 : index
      %c0_38 = arith.constant 0 : index
      %92 = vector.load %arg13[%c0_37, %c0_38] : memref<16x512xf32, #tpu.memory_space<vmem>>, vector<16x512xf32>
      %c0_39 = arith.constant 0 : index
      %c0_40 = arith.constant 0 : index
      %93 = vector.load %arg19[%c0_39, %c0_40] : memref<16x512xf32, #tpu.memory_space<vmem>>, vector<16x512xf32>
      tpu.vector_store %arg19[%c0_39, %c0_40], %92 {strides = array<i32>} : memref<16x512xf32, #tpu.memory_space<vmem>>, vector<16x512xf32>,
      %c0_41 = arith.constant 0 : index
      %c0_42 = arith.constant 0 : index
      %94 = vector.load %arg14[%c0_41, %c0_42] : memref<32x512xf32, #tpu.memory_space<vmem>>, vector<32x512xf32>
      %c0_43 = arith.constant 0 : index
      %c0_44 = arith.constant 0 : index
      %95 = vector.load %arg20[%c0_43, %c0_44] : memref<32x512xf32, #tpu.memory_space<vmem>>, vector<32x512xf32>
      tpu.vector_store %arg20[%c0_43, %c0_44], %94 {strides = array<i32>} : memref<32x512xf32, #tpu.memory_space<vmem>>, vector<32x512xf32>,
      %c0_45 = arith.constant 0 : index
      %c0_46 = arith.constant 0 : index
      %96 = vector.load %arg15[%c0_45, %c0_46] : memref<32x512xf32, #tpu.memory_space<vmem>>, vector<32x512xf32>
      %c0_47 = arith.constant 0 : index
      %c0_48 = arith.constant 0 : index
      %97 = vector.load %arg21[%c0_47, %c0_48] : memref<32x512xf32, #tpu.memory_space<vmem>>, vector<32x512xf32>
      tpu.vector_store %arg21[%c0_47, %c0_48], %96 {strides = array<i32>} : memref<32x512xf32, #tpu.memory_space<vmem>>, vector<32x512xf32>,
    } else {
    }
    %c0 = arith.constant 0 : index
    %c0_3 = arith.constant 0 : index
    %8 = vector.load %arg10[%c0, %c0_3] : memref<32x16xbf16, #tpu.memory_space<vmem>>, vector<32x16xbf16>
    %c0_4 = arith.constant 0 : index
    %c0_5 = arith.constant 0 : index
    %c0_6 = arith.constant 0 : index
    %9 = vector.load %arg11[%c0_4, %c0_5, %c0_6] : memref<1x16x32xbf16, #tpu.memory_space<vmem>>, vector<1x16x32xbf16>
    %10 = vector.shape_cast %9 : vector<1x16x32xbf16> to vector<16x32xbf16>
    %c0_7 = arith.constant 0 : index
    %c0_8 = arith.constant 0 : index
    %11 = vector.load %arg12[%c0_7, %c0_8] : memref<32x512xf32, #tpu.memory_space<vmem>>, vector<32x512xf32>
    %c0_9 = arith.constant 0 : index
    %c0_10 = arith.constant 0 : index
    %12 = vector.load %arg19[%c0_9, %c0_10] : memref<16x512xf32, #tpu.memory_space<vmem>>, vector<16x512xf32>
    %c0_11 = arith.constant 0 : index
    %c0_12 = arith.constant 0 : index
    %13 = vector.load %arg20[%c0_11, %c0_12] : memref<32x512xf32, #tpu.memory_space<vmem>>, vector<32x512xf32>
    %c0_13 = arith.constant 0 : index
    %c0_14 = arith.constant 0 : index
    %14 = vector.load %arg21[%c0_13, %c0_14] : memref<32x512xf32, #tpu.memory_space<vmem>>, vector<32x512xf32>
    %15 = arith.truncf %12 : vector<16x512xf32> to vector<16x512xbf16>
    %cst = arith.constant dense<0.000000e+00> : vector<32x512xf32>
    %16 = tpu.matmul %8, %15, %cst {dimension_numbers = #tpu.dot_dimension_numbers<[1], [0], [0], [1], [0, 0, 1, 1], [], []>} : vector<32x16xbf16>, vector<16x512xbf16>, vector<32x512xf32> -> vector<32x512xf32>
    %17 = arith.subf %16, %11 : vector<32x512xf32>
    %18 = arith.index_cast %1 : i32 to index
    %19 = memref.load %arg4[%18] : memref<6xf32, #tpu.memory_space<smem>>
    %20 = arith.addf %17, %13 : vector<32x512xf32>
    %21 = vector.broadcast %19 : f32 to vector<32x512xf32>
    %22 = arith.mulf %21, %20 : vector<32x512xf32>
    %23 = arith.addf %14, %22 : vector<32x512xf32>
    %24 = arith.index_cast %1 : i32 to index
    %25 = memref.load %arg7[%24] : memref<6xf32, #tpu.memory_space<smem>>
    %26 = vector.broadcast %25 : f32 to vector<32x512xf32>
    %27 = arith.mulf %26, %23 : vector<32x512xf32>
    %28 = arith.subf %13, %27 : vector<32x512xf32>
    %29 = arith.index_cast %1 : i32 to index
    %30 = memref.load %arg9[%29] : memref<6xf32, #tpu.memory_space<smem>>
    %31 = vector.broadcast %30 : f32 to vector<32x512xf32>
    %32 = arith.subf %28, %31 : vector<32x512xf32>
    %cst_15 = arith.constant 0.000000e+00 : f32
    %33 = vector.broadcast %cst_15 : f32 to vector<32x512xf32>
    %34 = arith.maximumf %32, %33 : vector<32x512xf32>
    %cst_16 = arith.constant 0.000000e+00 : f32
    %35 = vector.broadcast %cst_16 : f32 to vector<32x512xf32>
    %36 = arith.subf %35, %28 : vector<32x512xf32>
    %37 = vector.broadcast %30 : f32 to vector<32x512xf32>
    %38 = arith.subf %36, %37 : vector<32x512xf32>
    %cst_17 = arith.constant 0.000000e+00 : f32
    %39 = vector.broadcast %cst_17 : f32 to vector<32x512xf32>
    %40 = arith.maximumf %38, %39 : vector<32x512xf32>
    %41 = arith.subf %34, %40 : vector<32x512xf32>
    %42 = arith.subf %41, %13 : vector<32x512xf32>
    %43 = vector.broadcast %4 : f32 to vector<32x512xf32>
    %44 = arith.mulf %43, %42 : vector<32x512xf32>
    %45 = arith.addf %13, %44 : vector<32x512xf32>
    %46 = arith.index_cast %1 : i32 to index
    %47 = memref.load %arg5[%46] : memref<6xf32, #tpu.memory_space<smem>>
    %48 = arith.addf %17, %45 : vector<32x512xf32>
    %49 = vector.broadcast %47 : f32 to vector<32x512xf32>
    %50 = arith.mulf %49, %48 : vector<32x512xf32>
    %51 = vector.broadcast %4 : f32 to vector<32x512xf32>
    %52 = arith.mulf %51, %50 : vector<32x512xf32>
    %53 = arith.addf %14, %52 : vector<32x512xf32>
    %54 = arith.addf %17, %45 : vector<32x512xf32>
    %55 = arith.index_cast %arg1 : i32 to index
    %56 = memref.load %arg3[%55] : memref<6xf32, #tpu.memory_space<smem>>
    %57 = vector.broadcast %56 : f32 to vector<32x512xf32>
    %58 = arith.mulf %57, %54 : vector<32x512xf32>
    %59 = arith.addf %53, %58 : vector<32x512xf32>
    %60 = arith.truncf %59 : vector<32x512xf32> to vector<32x512xbf16>
    %cst_18 = arith.constant dense<0.000000e+00> : vector<16x512xf32>
    %61 = tpu.matmul %10, %60, %cst_18 {dimension_numbers = #tpu.dot_dimension_numbers<[1], [0], [0], [1], [0, 0, 1, 1], [], []>} : vector<16x32xbf16>, vector<32x512xbf16>, vector<16x512xf32> -> vector<16x512xf32>
    %62 = arith.index_cast %arg1 : i32 to index
    %63 = memref.load %arg6[%62] : memref<6xf32, #tpu.memory_space<smem>>
    %64 = vector.broadcast %63 : f32 to vector<16x512xf32>
    %65 = arith.mulf %64, %61 : vector<16x512xf32>
    %66 = arith.subf %12, %65 : vector<16x512xf32>
    %67 = arith.index_cast %arg1 : i32 to index
    %68 = memref.load %arg8[%67] : memref<6xf32, #tpu.memory_space<smem>>
    %69 = vector.broadcast %68 : f32 to vector<16x512xf32>
    %70 = arith.subf %66, %69 : vector<16x512xf32>
    %cst_19 = arith.constant 0.000000e+00 : f32
    %71 = vector.broadcast %cst_19 : f32 to vector<16x512xf32>
    %72 = arith.maximumf %70, %71 : vector<16x512xf32>
    %cst_20 = arith.constant 0.000000e+00 : f32
    %73 = vector.broadcast %cst_20 : f32 to vector<16x512xf32>
    %74 = arith.subf %73, %66 : vector<16x512xf32>
    %75 = vector.broadcast %68 : f32 to vector<16x512xf32>
    %76 = arith.subf %74, %75 : vector<16x512xf32>
    %cst_21 = arith.constant 0.000000e+00 : f32
    %77 = vector.broadcast %cst_21 : f32 to vector<16x512xf32>
    %78 = arith.maximumf %76, %77 : vector<16x512xf32>
    %79 = arith.subf %72, %78 : vector<16x512xf32>
    %c0_22 = arith.constant 0 : index
    %c0_23 = arith.constant 0 : index
    %80 = vector.load %arg19[%c0_22, %c0_23] : memref<16x512xf32, #tpu.memory_space<vmem>>, vector<16x512xf32>
    tpu.vector_store %arg19[%c0_22, %c0_23], %79 {strides = array<i32>} : memref<16x512xf32, #tpu.memory_space<vmem>>, vector<16x512xf32>,
    %c0_24 = arith.constant 0 : index
    %c0_25 = arith.constant 0 : index
    %81 = vector.load %arg20[%c0_24, %c0_25] : memref<32x512xf32, #tpu.memory_space<vmem>>, vector<32x512xf32>
    tpu.vector_store %arg20[%c0_24, %c0_25], %45 {strides = array<i32>} : memref<32x512xf32, #tpu.memory_space<vmem>>, vector<32x512xf32>,
    %c0_26 = arith.constant 0 : index
    %c0_27 = arith.constant 0 : index
    %82 = vector.load %arg21[%c0_26, %c0_27] : memref<32x512xf32, #tpu.memory_space<vmem>>, vector<32x512xf32>
    tpu.vector_store %arg21[%c0_26, %c0_27], %53 {strides = array<i32>} : memref<32x512xf32, #tpu.memory_space<vmem>>, vector<32x512xf32>,
    %c0_28 = arith.constant 0 : index
    %c0_29 = arith.constant 0 : index
    %c0_30 = arith.constant 0 : index
    %83 = vector.load %arg16[%c0_28, %c0_29, %c0_30] : memref<1x16x512xf32, #tpu.memory_space<vmem>>, vector<1x16x512xf32>
    %84 = vector.shape_cast %83 : vector<1x16x512xf32> to vector<16x512xf32>
    %85 = vector.shape_cast %79 : vector<16x512xf32> to vector<1x16x512xf32>
    tpu.vector_store %arg16[%c0_28, %c0_29, %c0_30], %85 {strides = array<i32>} : memref<1x16x512xf32, #tpu.memory_space<vmem>>, vector<1x16x512xf32>,
    %c0_31 = arith.constant 0 : index
    %c0_32 = arith.constant 0 : index
    %c0_33 = arith.constant 0 : index
    %86 = vector.load %arg17[%c0_31, %c0_32, %c0_33] : memref<1x32x512xf32, #tpu.memory_space<vmem>>, vector<1x32x512xf32>
    %87 = vector.shape_cast %86 : vector<1x32x512xf32> to vector<32x512xf32>
    %88 = vector.shape_cast %45 : vector<32x512xf32> to vector<1x32x512xf32>
    tpu.vector_store %arg17[%c0_31, %c0_32, %c0_33], %88 {strides = array<i32>} : memref<1x32x512xf32, #tpu.memory_space<vmem>>, vector<1x32x512xf32>,
    %c0_34 = arith.constant 0 : index
    %c0_35 = arith.constant 0 : index
    %c0_36 = arith.constant 0 : index
    %89 = vector.load %arg18[%c0_34, %c0_35, %c0_36] : memref<1x32x512xf32, #tpu.memory_space<vmem>>, vector<1x32x512xf32>
    %90 = vector.shape_cast %89 : vector<1x32x512xf32> to vector<32x512xf32>
    %91 = vector.shape_cast %53 : vector<32x512xf32> to vector<1x32x512xf32>
    tpu.vector_store %arg18[%c0_34, %c0_35, %c0_36], %91 {strides = array<i32>} : memref<1x32x512xf32, #tpu.memory_space<vmem>>, vector<1x32x512xf32>,
    return
  }
  func.func @transform_0(%arg0: i32, %arg1: i32, %arg2: memref<6xi32, #tpu.memory_space<smem>>, %arg3: memref<6xf32, #tpu.memory_space<smem>>, %arg4: memref<6xf32, #tpu.memory_space<smem>>, %arg5: memref<6xf32, #tpu.memory_space<smem>>, %arg6: memref<6xf32, #tpu.memory_space<smem>>, %arg7: memref<6xf32, #tpu.memory_space<smem>>, %arg8: memref<6xf32, #tpu.memory_space<smem>>, %arg9: memref<6xf32, #tpu.memory_space<smem>>) -> (i32, i32) {
    %c0_i32 = arith.constant 0 : i32
    %c0_i32_0 = arith.constant 0 : i32
    %c0_i32_1 = arith.constant 0 : i32
    return %c0_i32, %c0_i32_0 : i32, i32
  }
  func.func @transform_1(%arg0: i32, %arg1: i32, %arg2: memref<6xi32, #tpu.memory_space<smem>>, %arg3: memref<6xf32, #tpu.memory_space<smem>>, %arg4: memref<6xf32, #tpu.memory_space<smem>>, %arg5: memref<6xf32, #tpu.memory_space<smem>>, %arg6: memref<6xf32, #tpu.memory_space<smem>>, %arg7: memref<6xf32, #tpu.memory_space<smem>>, %arg8: memref<6xf32, #tpu.memory_space<smem>>, %arg9: memref<6xf32, #tpu.memory_space<smem>>) -> (i32, i32, i32) {
    %0 = arith.index_cast %arg1 : i32 to index
    %1 = memref.load %arg2[%0] : memref<6xi32, #tpu.memory_space<smem>>
    %c0_i32 = arith.constant 0 : i32
    %c0_i32_0 = arith.constant 0 : i32
    %c0_i32_1 = arith.constant 0 : i32
    return %1, %c0_i32, %c0_i32_0 : i32, i32, i32
  }
  func.func @transform_2(%arg0: i32, %arg1: i32, %arg2: memref<6xi32, #tpu.memory_space<smem>>, %arg3: memref<6xf32, #tpu.memory_space<smem>>, %arg4: memref<6xf32, #tpu.memory_space<smem>>, %arg5: memref<6xf32, #tpu.memory_space<smem>>, %arg6: memref<6xf32, #tpu.memory_space<smem>>, %arg7: memref<6xf32, #tpu.memory_space<smem>>, %arg8: memref<6xf32, #tpu.memory_space<smem>>, %arg9: memref<6xf32, #tpu.memory_space<smem>>) -> (i32, i32) {
    %c0_i32 = arith.constant 0 : i32
    %c0_i32_0 = arith.constant 0 : i32
    return %c0_i32, %arg0 : i32, i32
  }
  func.func @transform_3(%arg0: i32, %arg1: i32, %arg2: memref<6xi32, #tpu.memory_space<smem>>, %arg3: memref<6xf32, #tpu.memory_space<smem>>, %arg4: memref<6xf32, #tpu.memory_space<smem>>, %arg5: memref<6xf32, #tpu.memory_space<smem>>, %arg6: memref<6xf32, #tpu.memory_space<smem>>, %arg7: memref<6xf32, #tpu.memory_space<smem>>, %arg8: memref<6xf32, #tpu.memory_space<smem>>, %arg9: memref<6xf32, #tpu.memory_space<smem>>) -> (i32, i32) {
    %c0_i32 = arith.constant 0 : i32
    %c0_i32_0 = arith.constant 0 : i32
    return %c0_i32, %arg0 : i32, i32
  }
  func.func @transform_4(%arg0: i32, %arg1: i32, %arg2: memref<6xi32, #tpu.memory_space<smem>>, %arg3: memref<6xf32, #tpu.memory_space<smem>>, %arg4: memref<6xf32, #tpu.memory_space<smem>>, %arg5: memref<6xf32, #tpu.memory_space<smem>>, %arg6: memref<6xf32, #tpu.memory_space<smem>>, %arg7: memref<6xf32, #tpu.memory_space<smem>>, %arg8: memref<6xf32, #tpu.memory_space<smem>>, %arg9: memref<6xf32, #tpu.memory_space<smem>>) -> (i32, i32) {
    %c0_i32 = arith.constant 0 : i32
    %c0_i32_0 = arith.constant 0 : i32
    return %c0_i32, %arg0 : i32, i32
  }
  func.func @transform_5(%arg0: i32, %arg1: i32, %arg2: memref<6xi32, #tpu.memory_space<smem>>, %arg3: memref<6xf32, #tpu.memory_space<smem>>, %arg4: memref<6xf32, #tpu.memory_space<smem>>, %arg5: memref<6xf32, #tpu.memory_space<smem>>, %arg6: memref<6xf32, #tpu.memory_space<smem>>, %arg7: memref<6xf32, #tpu.memory_space<smem>>, %arg8: memref<6xf32, #tpu.memory_space<smem>>, %arg9: memref<6xf32, #tpu.memory_space<smem>>) -> (i32, i32) {
    %c0_i32 = arith.constant 0 : i32
    %c0_i32_0 = arith.constant 0 : i32
    return %c0_i32, %arg0 : i32, i32
  }
  func.func @transform_6(%arg0: i32, %arg1: i32, %arg2: memref<6xi32, #tpu.memory_space<smem>>, %arg3: memref<6xf32, #tpu.memory_space<smem>>, %arg4: memref<6xf32, #tpu.memory_space<smem>>, %arg5: memref<6xf32, #tpu.memory_space<smem>>, %arg6: memref<6xf32, #tpu.memory_space<smem>>, %arg7: memref<6xf32, #tpu.memory_space<smem>>, %arg8: memref<6xf32, #tpu.memory_space<smem>>, %arg9: memref<6xf32, #tpu.memory_space<smem>>) -> (i32, i32, i32) {
    %c0_i32 = arith.constant 0 : i32
    %c0_i32_0 = arith.constant 0 : i32
    return %arg1, %c0_i32, %arg0 : i32, i32, i32
  }
  func.func @transform_7(%arg0: i32, %arg1: i32, %arg2: memref<6xi32, #tpu.memory_space<smem>>, %arg3: memref<6xf32, #tpu.memory_space<smem>>, %arg4: memref<6xf32, #tpu.memory_space<smem>>, %arg5: memref<6xf32, #tpu.memory_space<smem>>, %arg6: memref<6xf32, #tpu.memory_space<smem>>, %arg7: memref<6xf32, #tpu.memory_space<smem>>, %arg8: memref<6xf32, #tpu.memory_space<smem>>, %arg9: memref<6xf32, #tpu.memory_space<smem>>) -> (i32, i32, i32) {
    %c0_i32 = arith.constant 0 : i32
    %c0_i32_0 = arith.constant 0 : i32
    return %arg1, %c0_i32, %arg0 : i32, i32, i32
  }
  func.func @transform_8(%arg0: i32, %arg1: i32, %arg2: memref<6xi32, #tpu.memory_space<smem>>, %arg3: memref<6xf32, #tpu.memory_space<smem>>, %arg4: memref<6xf32, #tpu.memory_space<smem>>, %arg5: memref<6xf32, #tpu.memory_space<smem>>, %arg6: memref<6xf32, #tpu.memory_space<smem>>, %arg7: memref<6xf32, #tpu.memory_space<smem>>, %arg8: memref<6xf32, #tpu.memory_space<smem>>, %arg9: memref<6xf32, #tpu.memory_space<smem>>) -> (i32, i32, i32) {
    %c0_i32 = arith.constant 0 : i32
    %c0_i32_0 = arith.constant 0 : i32
    return %arg1, %c0_i32, %arg0 : i32, i32, i32
  }
}

</mosaic_0001>

<bundles_post_ra>
// kernel: tpu_custom_call.1
= control target key start
LH: loop header
LB: loop body
LE: loop exit
PB: predicated region body
PF: predicated region fallthrough
CT: control target
= control target key end

     0   :  { %s2239_s27 = smov [#allocation6]   ;;  %s2240_s28 = smov [#allocation7]   ;;  %s3299_s0 = inlined_call_operand.vmem [shape: s32[6], index: 0, kind: input, shape index: {}]   ;;  %s3300_s8 = inlined_call_operand.vmem [shape: bf16[32,16], index: 8, kind: input, shape index: {}]   ;;  %s3301_s9 = inlined_call_operand.vmem [shape: bf16[2,16,32], index: 9, kind: input, shape index: {}]   ;;  %s3302_s10 = inlined_call_operand.hbm [shape: f32[32,1024], index: 10, kind: input, shape index: {}]   ;;  %s3303_s11 = inlined_call_operand.hbm [shape: f32[16,1024], index: 11, kind: input, shape index: {}]   ;;  %s3304_s12 = inlined_call_operand.hbm [shape: f32[32,1024], index: 12, kind: input, shape index: {}]   ;;  %s3305_s13 = inlined_call_operand.hbm [shape: f32[32,1024], index: 13, kind: input, shape index: {}]   ;;  %s3306_s14 = inlined_call_operand.hbm [shape: f32[6,16,1024], index: 14, kind: output, shape index: {0}]   ;;  %s3307_s15 = inlined_call_operand.hbm [shape: f32[6,32,1024], index: 15, kind: output, shape index: {1}]   ;;  %s3308_s16 = inlined_call_operand.hbm [shape: f32[6,32,1024], index: 16, kind: output, shape index: {2}]   ;;  %s3309_s1 = inlined_call_operand.vmem [shape: f32[6], index: 1, kind: input, shape index: {}]   ;;  %s3310_s2 = inlined_call_operand.vmem [shape: f32[6], index: 2, kind: input, shape index: {}]   ;;  %s3311_s3 = inlined_call_operand.vmem [shape: f32[6], index: 3, kind: input, shape index: {}]   ;;  %s3312_s4 = inlined_call_operand.vmem [shape: f32[6], index: 4, kind: input, shape index: {}]   ;;  %s3313_s5 = inlined_call_operand.vmem [shape: f32[6], index: 5, kind: input, shape index: {}]   ;;  %s3314_s6 = inlined_call_operand.vmem [shape: f32[6], index: 6, kind: input, shape index: {}]   ;;  %s3315_s7 = inlined_call_operand.vmem [shape: f32[6], index: 7, kind: input, shape index: {}]  }
   0x1   :  { %3340 = sst [smem:[#allocation48_spill]] %s3299_s0  ;;  %s28_s26 = sshll.u32 %s3309_s1, 4  ;;  %s29_s26 = int_to_ptr.vmem [resolvable:$true] %s28_s26 }
   0x2   :  { %3341 = sst [smem:[#allocation49_spill]] %s3300_s8  ;;  %s33_s0 = sshll.u32 %s3310_s2, 4  ;;  %s34_s0 = int_to_ptr.vmem [resolvable:$true] %s33_s0 }
   0x3   :  { %3342 = sst [smem:[#allocation50_spill]] %s3301_s9  ;;  %s38_s19 = sshll.u32 %s3311_s3, 4  ;;  %s39_s19 = int_to_ptr.vmem [resolvable:$true] %s38_s19 }
   0x4   :  { %3343 = sst [smem:[#allocation51_spill]] %s3302_s10  ;;  %s2241_s20 = smov [#allocation8]  }
   0x5   :  { %3344 = sst [smem:[#allocation52_spill]] %s3303_s11  ;;  %s2242_s21 = smov [#allocation9]  }
   0x6   :  { %3345 = sst [smem:[#allocation53_spill]] %s3304_s12  ;;  %s48_s25 = sshll.u32 %s3313_s5, 4  ;;  %s49_s25 = int_to_ptr.vmem [resolvable:$true] %s48_s25 }
   0x7   :  { %3346 = sst [smem:[#allocation54_spill]] %s3305_s13  ;;  %s2243_s2 = smov [#allocation10]  }
   0x8   :  { %3347 = sst [smem:[#allocation55_spill]] %s3306_s14  ;;  %s2246_s17 = smov [#allocation13]  }
   0x9   :  { %3348 = sst [smem:[#allocation56_spill]] %s3307_s15 }
   0xa   :  { %3349 = sst [smem:[#allocation57_spill]] %s3308_s16 }
   0xb   :  { %s3350_s23 = sld [smem:[#allocation48_spill]] }
  0x11   :  { %s23_s14 = sshll.u32 %s3350_s23, 4  ;;  %s24_s14 = int_to_ptr.vmem [resolvable:$true] %s23_s14 }
  0x12   :  { %26 = dma.vmem_to_smem %s24_s14, 16, %s2239_s27, [#allocation5] }
  0x13   :  { %31 = dma.vmem_to_smem %s29_s26, 16, %s2240_s28, [#allocation5] }
  0x14   :  { %36 = dma.vmem_to_smem %s34_s0, 16, %s2241_s20, [#allocation5] }
  0x15   :  { %41 = dma.vmem_to_smem %s39_s19, 16, %s2242_s21, [#allocation5] }
  0x16   :  { %s43_s14 = sshll.u32 %s3312_s4, 4  ;;  %s2244_s26 = smov [#allocation11]   ;;  %s44_s14 = int_to_ptr.vmem [resolvable:$true] %s43_s14 }
  0x17   :  { %46 = dma.vmem_to_smem %s44_s14, 16, %s2243_s2, [#allocation5] }
  0x18   :  { %51 = dma.vmem_to_smem %s49_s25, 16, %s2244_s26, [#allocation5] }
  0x19   :  { %s53_s28 = sshll.u32 %s3314_s6, 4  ;;  %s58_s0 = sshll.u32 %s3315_s7, 4  ;;  %s54_s28 = int_to_ptr.vmem [resolvable:$true] %s53_s28  ;;  %s59_s0 = int_to_ptr.vmem [resolvable:$true] %s58_s0 }
  0x1a   :  { %s2245_s4 = smov [#allocation12]  }
  0x1b   :  { %56 = dma.vmem_to_smem %s54_s28, 16, %s2245_s4, [#allocation5] }
  0x1c   :  { %61 = dma.vmem_to_smem %s59_s0, 16, %s2246_s17, [#allocation5] }
  0x1d   :  { %2173 = dma.done.wait [#allocation5], 128 }
  0x1e   :  { %2174 = vsyncadd [#allocation5], 4294967168 }
  0x1f   :  { %64 = sfence }
  0x20   :  { %65 = vsyncpa [#allocation15], 0 }
  0x21   :  { %67 = vsyncpa [#allocation15 + $0x1], 0 }
  0x22   :  { %68 = vsyncpa [#allocation18], 0 }
  0x23   :  { %69 = vsyncpa [#allocation21], 0 }
  0x24   :  { %70 = vsyncpa [#allocation16], 0 }
  0x25   :  { %72 = vsyncpa [#allocation16 + $0x1], 0 }
  0x26   :  { %73 = vsyncpa [#allocation24], 0 }
  0x27   :  { %75 = vsyncpa [#allocation24 + $0x1], 0  ;;  %s2365_s5 = smov 0   ;;  %s2367_s6 = smov 0  }
  0x28   :  { %s2369_s7 = smov 0   ;;  %s2371_s18 = smov 0  }
  0x29   :  { %s2373_s19 = smov 0   ;;  %s2375_s20 = smov 0  }
  0x2a   :  { %s2377_s21 = smov 0   ;;  %s2379_s1 = smov 0  }
  0x2b   :  { %s2381_s22 = smov 0   ;;  %s2383_s14 = smov 0  }
  0x2c   :  { %s2385_s23 = smov 0  }
  0x2d LB: > { %3351 = sst [smem:[#allocation32_spill]] %s2197_s5  ;;  %s2419_s24 = sadd.s32 4294967295, %s2237_s23   ;;  %s2237_s23 = sphi %s2385_s23, %s81_s23   ;;  %s2233_s14 = sphi %s2383_s14, %s3401_s14   ;;  %s2229_s22 = sphi %s2381_s22, %s3400_s22   ;;  %s2225_s1 = sphi %s2379_s1, %s3399_s1   ;;  %s2221_s21 = sphi %s2377_s21, %s3398_s21   ;;  %s2217_s20 = sphi %s2375_s20, %s3407_s20   ;;  %s2213_s19 = sphi %s2373_s19, %s3406_s19   ;;  %s2209_s18 = sphi %s2371_s18, %s3405_s18   ;;  %s2205_s7 = sphi %s2369_s7, %s3404_s7   ;;  %s2201_s6 = sphi %s2367_s6, %s3403_s6   ;;  %s2197_s5 = sphi %s2365_s5, %s3402_s5  }
  0x2e   : > { %3352 = sst [smem:[#allocation33_spill]] %s2225_s1  ;;  %s3317_s25 = sadd.s32 4294967294, %s2237_s23  }
  0x2f   : > { %3353 = sst [smem:[#allocation34_spill]] %s2229_s22  ;;  %p162_p0 = scmp.ne.s32.totalorder %s2213_s19, %s2209_s18 }
  0x30   : > { %3354 = sst [smem:[#allocation35_spill]] %s2233_s14  ;;  %p163_p1 = scmp.eq.s32.totalorder %s2419_s24, 0 }
  0x31   : > { %3355 = sst [smem:[#allocation36_spill]] %s2419_s24  ;;  %p265_p2 = scmp.ne.s32.totalorder %s2205_s7, %s2201_s6 }
  0x32   : > { %p266_p3 = scmp.eq.s32.totalorder %s2419_s24, 11  ;;  %p2427_p4 = por %p163_p1, %p162_p0 }
  0x33   : > { %p271_p5 = scmp.ne.s32.totalorder %s2201_s6, %s2197_s5  ;;  %p272_p7 = scmp.eq.s32.totalorder %s3317_s25, 11 }
  0x34   : > { %p2433_p6 = por %p266_p3, %p265_p2  ;;  %p1610_p8 = scmp.ge.s32.totalorder %s2237_s23, 1 }
  0x35   : > { %p335_p9 = scmp.lt.s32.totalorder %s2237_s23, 13  ;;  %p2441_p10 = por %p272_p7, %p271_p5 }
  0x36   : > { %s3357_s26 = scalar_select %p2433_p6, 1, 0 }
  0x37   : > { %s3359_s3 = scalar_select %p2441_p10, 1, 0 }
  0x38   : > { %3358 = sst [smem:[#allocation37_spill]] %s3357_s26  ;;  %s2446_s27 = sshll.u32 %s2225_s1, 5 }
  0x39   : > { %3360 = sst [smem:[#allocation38_spill]] %s3359_s3  ;;  %p2448_p11 = pnand %p1610_p8, %p335_p9 }
  0x3a   : > { %s3362_s11 = sld [smem:[#allocation52_spill]]  ;;  %s2247_s17 = smov [#allocation17]  }
  0x3b   : > { %p1690_p12 = pneg %p2448_p11  ;;  %s354_s18 = sshll.u32 %s2247_s17, 4  ;;  %s355_s18 = int_to_ptr.vmem [resolvable:$true] %s354_s18 }
  0x3d   : > { %p2460_p13 = pnand %p1690_p12, %p2427_p4 }
  0x3f   : > { %p1929_p1 = pneg %p2460_p13 }
  0x40   : > { %s351_s0 = scalar_lea.hbm %s3362_s11, %s2446_s27 }
  0x41   : > { %s352_s4 = sshll.u32 %s351_s0, 4  ;;  %s1932_s0 = scalar_lea.hbm %s3362_s11, 128  ;;  %s353_s4 = int_to_ptr.hbm [resolvable:$true] %s352_s4 }
  0x42   : > { %s1925_s3 = sshra.s32 %s353_s4, 4  ;;  %s1926_s3 = int_to_ptr.hbm [resolvable:$true] %s1925_s3 }
  0x43   : > { %s1927_s5 = scalar_lea.hbm %s1926_s3, 64  ;;  %p1933_p5 = scmp.lt.s32.totalorder %s1926_s3, %s3362_s11 }
  0x44   : > { %p1928_p0 = scmp.ne.s32.totalorder %s1926_s3, %s1927_s5  ;;  %p1934_p7 = scmp.lt.s32.totalorder %s1932_s0, %s1927_s5 }
  0x46   : > { %p1930_p2 = pnand %p1929_p1, %p1928_p0  ;;  %p1935_p8 = por %p1934_p7, %p1933_p5 }
  0x48   : > { %p1931_p3 = pneg %p1930_p2 }
  0x4a   : > { %p1936_p9 = pnand %p1935_p8, %p1931_p3 }
  0x4c   : > { %1939 = shalt.err (!%p1936_p9)
}
  0x4d   : > { %s3328_s15 = smov 1024   ;;  %s3329_s26 = smov 512  }
  0x4e   : > { %s3330_s1 = smov 32   ;;  %s3364_s12 = sld [smem:[#allocation53_spill]] }
  0x4f   : > { %1693 = dma.hbm_to_vmem [thread:$0]  (!%p2460_p13), %s353_s4, 1024, %s355_s18, [#allocation18], %s3328_s15, %s3329_s26, %s3330_s1  }
  0x50   : > { %s2251_s5 = smov [#allocation19]  }
  0x51   : > { %s371_s0 = sshll.u32 %s2251_s5, 4  ;;  %s372_s0 = int_to_ptr.vmem [resolvable:$true] %s371_s0 }
  0x54   : > { %s368_s16 = scalar_lea.hbm %s3364_s12, %s2446_s27  ;;  %s1962_s4 = scalar_lea.hbm %s3364_s12, 256 }
  0x55   : > { %s369_s3 = sshll.u32 %s368_s16, 4  ;;  %s370_s3 = int_to_ptr.hbm [resolvable:$true] %s369_s3 }
  0x56   : > { %s1955_s17 = sshra.s32 %s370_s3, 4  ;;  %s1956_s17 = int_to_ptr.hbm [resolvable:$true] %s1955_s17 }
  0x57   : > { %s1957_s11 = scalar_lea.hbm %s1956_s17, 128  ;;  %p1963_p3 = scmp.lt.s32.totalorder %s1956_s17, %s3364_s12 }
  0x58   : > { %p1958_p12 = scmp.ne.s32.totalorder %s1956_s17, %s1957_s11  ;;  %p1964_p5 = scmp.lt.s32.totalorder %s1962_s4, %s1957_s11 }
  0x5a   : > { %p1960_p0 = pnand %p1958_p12, %p1929_p1  ;;  %p1965_p7 = por %p1964_p5, %p1963_p3 }
  0x5c   : > { %p1961_p2 = pneg %p1960_p0 }
  0x5e   : > { %p1966_p8 = pnand %p1965_p7, %p1961_p2 }
  0x60   : > { %1969 = shalt.err (!%p1966_p8)
}
  0x61   : > { %1696 = dma.hbm_to_vmem [thread:$0]  (!%p2460_p13), %s370_s3, 2048, %s372_s0, [#allocation18], %s3328_s15, %s3329_s26, %s3330_s1  }
  0x62   : > { %s3365_s13 = sld [smem:[#allocation54_spill]]  ;;  %s2252_s5 = smov [#allocation20]  }
  0x63   : > { %s388_s18 = sshll.u32 %s2252_s5, 4  ;;  %s389_s18 = int_to_ptr.vmem [resolvable:$true] %s388_s18 }
  0x68   : > { %s385_s8 = scalar_lea.hbm %s3365_s13, %s2446_s27  ;;  %s1992_s3 = scalar_lea.hbm %s3365_s13, 256 }
  0x69   : > { %s386_s24 = sshll.u32 %s385_s8, 4  ;;  %s387_s24 = int_to_ptr.hbm [resolvable:$true] %s386_s24 }
  0x6a   : > { %s1985_s11 = sshra.s32 %s387_s24, 4  ;;  %s1986_s11 = int_to_ptr.hbm [resolvable:$true] %s1985_s11 }
  0x6b   : > { %s1987_s17 = scalar_lea.hbm %s1986_s11, 128  ;;  %p1993_p2 = scmp.lt.s32.totalorder %s1986_s11, %s3365_s13 }
  0x6c   : > { %p1988_p9 = scmp.ne.s32.totalorder %s1986_s11, %s1987_s17  ;;  %p1994_p3 = scmp.lt.s32.totalorder %s1992_s3, %s1987_s17 }
  0x6e   : > { %p1990_p12 = pnand %p1988_p9, %p1929_p1  ;;  %p1995_p5 = por %p1994_p3, %p1993_p2 }
  0x70   : > { %p1991_p0 = pneg %p1990_p12 }
  0x72   : > { %p1996_p7 = pnand %p1995_p5, %p1991_p0 }
  0x74   : > { %1999 = shalt.err (!%p1996_p7)
}
  0x75   : > { %1699 = dma.hbm_to_vmem [thread:$0]  (!%p2460_p13), %s387_s24, 2048, %s389_s18, [#allocation21], %s3328_s15, %s3329_s26, %s3330_s1  }
  0x76   : > { %s90_s27 = sadd.s32 1, %s2229_s22  ;;  %s93_s16 = sadd.s32 1, %s2233_s14 }
  0x77   : > { %p91_p1 = scmp.ge.s32.totalorder %s90_s27, 6  ;;  %s149_s25 = sadd.s32 1, %s2217_s20 }
  0x78   : > { %p156_p8 = scmp.ne.s32.totalorder %s2217_s20, %s2213_s19  ;;  %p157_p9 = scmp.eq.s32.totalorder %s2237_s23, 0 }
  0x79   : > { %s3409_s27 = smov (%p91_p1, %s90_s27), 0  ;;  %s3411_s16 = smov (!%p91_p1, %s93_s16), %s2233_s14 }
  0x7a   : > { %3366 = sst [smem:[#allocation39_spill]] %s3409_s27  ;;  %p2525_p12 = por %p157_p9, %p156_p8 }
  0x7b   : > { %s250_s5 = ssub.s32 %s2229_s22, %s3409_s27  ;;  %p95_p13 = scmp.ge.s32.totalorder %s3411_s16, 2 }
  0x7c   : > { %s255_s24 = sadd.s32 1, %s2205_s7  ;;  %p1714_p0 = scmp.lt.s32.totalorder %s2237_s23, 12 }
  0x7d   : > { %s412_s18 = sand.u32 1, %s2217_s20   ;;  %s3413_s16 = smov (%p95_p13, %s3411_s16), 0 }
  0x7e   : > { %3368 = sst [smem:[#allocation40_spill]] %s3413_s16  ;;  %s1618_s11 = sshll.u32 %s412_s18, 7 }
  0x7f   : > { %s146_s17 = ssub.s32 %s2233_s14, %s3413_s16  ;;  %s1671_s29 = sshll.u32 %s2233_s14, 5 }
  0x80   : > { %p147_p2 = scmp.eq.s32.totalorder %s146_s17, 0  ;;  %s252_s4 = sor.u32 %s250_s5, %s146_s17 }
  0x81   : > { %p253_p3 = scmp.eq.s32.totalorder %s252_s4, 0  ;;  %s3370_s10 = sld [smem:[#allocation51_spill]] }
  0x82   : > { %s2540_s3 = scalar_select %p147_p2, %s2217_s20, %s149_s25  }
  0x83   : > { %s2543_s0 = scalar_select %p253_p3, %s2205_s7, %s255_s24  }
  0x84   : > { %3369 = sst [smem:[#allocation41_spill]] %s2540_s3  ;;  %s416_s1 = scalar_lea.vmem [#allocation14], %s1618_s11 }
  0x85   : > { %s424_s12 = sshll.u32 %s416_s1, 4  ;;  %p1701_p5 = pnand %p1714_p0, %p2525_p12  ;;  %s425_s12 = int_to_ptr.vmem [resolvable:$true] %s424_s12 }
  0x86   : > { %s413_s16 = scalar_lea.sflag [#allocation15], %s412_s18  ;;  %s3371_s5 = smov 32  }
  0x87   : > { %s421_s26 = scalar_lea.hbm %s3370_s10, %s1671_s29  ;;  %s3372_s17 = smov 512  }
  0x88   : > { %s422_s13 = sshll.u32 %s421_s26, 4  ;;  %s3373_s4 = smov 1024   ;;  %s423_s13 = int_to_ptr.hbm [resolvable:$true] %s422_s13 }
  0x89   : > { %1703 = dma.hbm_to_vmem [thread:$0]  (!%p1701_p5), %s423_s13, 2048, %s425_s12, %s413_s16, %s3373_s4, %s3372_s17, %s3371_s5  }
  0x8a   : > { %436 = sbr.rel (%p2448_p11) target bundleno = 608 (0x260), region = 44 }
  0x8f   : > { %s438_s15 = sand.u32 1, %s2213_s19  }
  0x90   : > { %s1622_s25 = sshll.u32 %s438_s15, 7  ;;  %s439_s24 = scalar_lea.sflag [#allocation15], %s438_s15 }
  0x91   : > { %s2558_s1 = scalar_lea.vmem [#allocation14], %s1622_s25 }
  0x92   : > { %2176 = dma.done.wait (%p2427_p4), %s439_s24, 2048  }
  0x93   : > { %2178 = vsyncadd (%p2427_p4), %s439_s24, 4294965248 }
  0x94   : > { %2180 = dma.done.wait (%p2427_p4), [#allocation18], 3072  }
  0x95   : > { %2182 = vsyncadd (%p2427_p4), [#allocation18], 4294964224 }
  0x96   : > { %2184 = dma.done.wait (%p2427_p4), [#allocation21], 2048  }
  0x97   : > { %2186 = vsyncadd (%p2427_p4), [#allocation21], 4294965248  ;;  %s2573_s12 = sand.u32 1, %s2201_s6   ;;  %s1628_s13 = sadd.s32 4294967295, %s2221_s21 }
  0x98   : > { %s507_s26 = sld [smem:[#allocation6 + %s2221_s21]]  ;;  %s1623_s28 = sshll.u32 %s2573_s12, 6 }
  0x99   : > { %s1624_s16 = sshll.u32 %s2573_s12, 7  ;;  %p523_p11 = scmp.gt.s32.totalorder %s1628_s13, 0 }
  0x9a   : > { %p525_p7 = scmp.gt.s32.totalorder %s2221_s21, 0  ;;  %s3374_s9 = sld [smem:[#allocation50_spill]] }
  0x9b   : > { %s3415_s13 = smov (!%p523_p11, %s1628_s13), 0  ;;  %s2590_s5 = scalar_lea.vmem [#allocation22], %s1623_s28 }
  0x9c   : > { %s2582_s8 = scalar_select %p525_p7, 1, 0 }
  0x9d   : > { %s2592_s17 = scalar_lea.vmem [#allocation23], %s1624_s16  ;;  %s2594_s4 = scalar_lea.vmem [#allocation25], %s1624_s16 }
  0x9e   : > { %p508_p1 = scmp.lt.s32.totalorder %s507_s26, 1  ;;  %s527_s2 = scvt.s32.f32 %s2582_s8 }
  0x9f   : > { %p1629_p4 = scmp.ne.s32.totalorder %s2221_s21, 0 }
  0xa0   : > { %s3417_s26 = smov (!%p508_p1, %s507_s26), 1 }
  0xa1   : > { %s1672_s18 = sshll.u32 %s3417_s26, 3  ;;  %531 = sbr.rel (%p1629_p4) target bundleno = 207 (0xcf), region = 64 }
  0xa2   : > { %s2588_s30 = scalar_lea.vmem %s3374_s9, %s1672_s18 }
  0xa6   : > { %v532_v0 = vld [vmem:[#allocation17] sm:$0xff]  ;;  %v533_v1 = vld [vmem:[#allocation17 + $0x8] sm:$0xff]  ;;  %v534_v2 = vld [vmem:[#allocation17 + $0x10] sm:$0xff] }
  0xa7   : > { %540 = vst [vmem:[#allocation2 + $0x30] sm:$0xff] %v532_v0  ;;  %v535_v3 = vld [vmem:[#allocation17 + $0x18] sm:$0xff]  ;;  %v536_v4 = vld [vmem:[#allocation17 + $0x20] sm:$0xff]  ;;  %v537_v5 = vld [vmem:[#allocation17 + $0x28] sm:$0xff] }
  0xa8   : > { %541 = vst [vmem:[#allocation2] sm:$0xff] %v533_v1  ;;  %v538_v6 = vld [vmem:[#allocation17 + $0x30] sm:$0xff]  ;;  %v539_v7 = vld [vmem:[#allocation17 + $0x38] sm:$0xff]  ;;  %v548_v8 = vld [vmem:[#allocation19] sm:$0xff] }
  0xa9   : > { %542 = vst [vmem:[#allocation2 + $0x18] sm:$0xff] %v534_v2  ;;  %v549_v9 = vld [vmem:[#allocation19 + $0x8] sm:$0xff]  ;;  %v550_v10 = vld [vmem:[#allocation19 + $0x10] sm:$0xff]  ;;  %v551_v11 = vld [vmem:[#allocation19 + $0x18] sm:$0xff] }
  0xaa   : > { %543 = vst [vmem:[#allocation2 + $0x10] sm:$0xff] %v535_v3  ;;  %v552_v12 = vld [vmem:[#allocation19 + $0x20] sm:$0xff]  ;;  %v553_v13 = vld [vmem:[#allocation19 + $0x28] sm:$0xff]  ;;  %v554_v14 = vld [vmem:[#allocation19 + $0x30] sm:$0xff] }
  0xab   : > { %544 = vst [vmem:[#allocation2 + $0x8] sm:$0xff] %v536_v4  ;;  %v555_v15 = vld [vmem:[#allocation19 + $0x38] sm:$0xff]  ;;  %v556_v16 = vld [vmem:[#allocation19 + $0x40] sm:$0xff]  ;;  %v557_v17 = vld [vmem:[#allocation19 + $0x48] sm:$0xff] }
  0xac   : > { %545 = vst [vmem:[#allocation2 + $0x20] sm:$0xff] %v537_v5  ;;  %v558_v18 = vld [vmem:[#allocation19 + $0x50] sm:$0xff]  ;;  %v559_v19 = vld [vmem:[#allocation19 + $0x58] sm:$0xff]  ;;  %v560_v20 = vld [vmem:[#allocation19 + $0x60] sm:$0xff] }
  0xad   : > { %546 = vst [vmem:[#allocation2 + $0x28] sm:$0xff] %v538_v6  ;;  %v561_v21 = vld [vmem:[#allocation19 + $0x68] sm:$0xff]  ;;  %v562_v22 = vld [vmem:[#allocation19 + $0x70] sm:$0xff]  ;;  %v563_v23 = vld [vmem:[#allocation19 + $0x78] sm:$0xff] }
  0xae   : > { %547 = vst [vmem:[#allocation2 + $0x38] sm:$0xff] %v539_v7  ;;  %v580_v24 = vld [vmem:[#allocation20] sm:$0xff]  ;;  %v581_v25 = vld [vmem:[#allocation20 + $0x8] sm:$0xff]  ;;  %v582_v26 = vld [vmem:[#allocation20 + $0x10] sm:$0xff] }
  0xaf   : > { %564 = vst [vmem:[#allocation3] sm:$0xff] %v548_v8  ;;  %v583_v27 = vld [vmem:[#allocation20 + $0x18] sm:$0xff]  ;;  %v584_v28 = vld [vmem:[#allocation20 + $0x20] sm:$0xff]  ;;  %v585_v29 = vld [vmem:[#allocation20 + $0x28] sm:$0xff] }
  0xb0   : > { %565 = vst [vmem:[#allocation3 + $0x18] sm:$0xff] %v549_v9  ;;  %v586_v30 = vld [vmem:[#allocation20 + $0x30] sm:$0xff]  ;;  %v587_v31 = vld [vmem:[#allocation20 + $0x38] sm:$0xff]  ;;  %v588_v32 = vld [vmem:[#allocation20 + $0x40] sm:$0xff] }
  0xb1   : > { %566 = vst [vmem:[#allocation3 + $0x50] sm:$0xff] %v550_v10  ;;  %v589_v33 = vld [vmem:[#allocation20 + $0x48] sm:$0xff]  ;;  %v590_v34 = vld [vmem:[#allocation20 + $0x50] sm:$0xff]  ;;  %v591_v35 = vld [vmem:[#allocation20 + $0x58] sm:$0xff] }
  0xb2   : > { %567 = vst [vmem:[#allocation3 + $0x60] sm:$0xff] %v551_v11  ;;  %v592_v36 = vld [vmem:[#allocation20 + $0x60] sm:$0xff]  ;;  %v593_v37 = vld [vmem:[#allocation20 + $0x68] sm:$0xff]  ;;  %v594_v38 = vld [vmem:[#allocation20 + $0x70] sm:$0xff] }
  0xb3   : > { %568 = vst [vmem:[#allocation3 + $0x68] sm:$0xff] %v552_v12  ;;  %v595_v39 = vld [vmem:[#allocation20 + $0x78] sm:$0xff] }
  0xb4   : > { %569 = vst [vmem:[#allocation3 + $0x20] sm:$0xff] %v553_v13 }
  0xb5   : > { %570 = vst [vmem:[#allocation3 + $0x70] sm:$0xff] %v554_v14 }
  0xb6   : > { %571 = vst [vmem:[#allocation3 + $0x10] sm:$0xff] %v555_v15 }
  0xb7   : > { %572 = vst [vmem:[#allocation3 + $0x28] sm:$0xff] %v556_v16 }
  0xb8   : > { %573 = vst [vmem:[#allocation3 + $0x40] sm:$0xff] %v557_v17 }
  0xb9   : > { %574 = vst [vmem:[#allocation3 + $0x38] sm:$0xff] %v558_v18 }
  0xba   : > { %575 = vst [vmem:[#allocation3 + $0x8] sm:$0xff] %v559_v19 }
  0xbb   : > { %576 = vst [vmem:[#allocation3 + $0x58] sm:$0xff] %v560_v20 }
  0xbc   : > { %577 = vst [vmem:[#allocation3 + $0x48] sm:$0xff] %v561_v21 }
  0xbd   : > { %578 = vst [vmem:[#allocation3 + $0x78] sm:$0xff] %v562_v22 }
  0xbe   : > { %579 = vst [vmem:[#allocation3 + $0x30] sm:$0xff] %v563_v23 }
  0xbf   : > { %596 = vst [vmem:[#allocation4 + $0x30] sm:$0xff] %v580_v24 }
  0xc0   : > { %597 = vst [vmem:[#allocation4] sm:$0xff] %v581_v25 }
  0xc1   : > { %598 = vst [vmem:[#allocation4 + $0x40] sm:$0xff] %v582_v26 }
  0xc2   : > { %599 = vst [vmem:[#allocation4 + $0x58] sm:$0xff] %v583_v27 }
  0xc3   : > { %600 = vst [vmem:[#allocation4 + $0x8] sm:$0xff] %v584_v28 }
  0xc4   : > { %601 = vst [vmem:[#allocation4 + $0x28] sm:$0xff] %v585_v29 }
  0xc5   : > { %602 = vst [vmem:[#allocation4 + $0x38] sm:$0xff] %v586_v30 }
  0xc6   : > { %603 = vst [vmem:[#allocation4 + $0x20] sm:$0xff] %v587_v31 }
  0xc7   : > { %604 = vst [vmem:[#allocation4 + $0x78] sm:$0xff] %v588_v32 }
  0xc8   : > { %605 = vst [vmem:[#allocation4 + $0x50] sm:$0xff] %v589_v33 }
  0xc9   : > { %606 = vst [vmem:[#allocation4 + $0x18] sm:$0xff] %v590_v34 }
  0xca   : > { %607 = vst [vmem:[#allocation4 + $0x70] sm:$0xff] %v591_v35 }
  0xcb   : > { %608 = vst [vmem:[#allocation4 + $0x60] sm:$0xff] %v592_v36 }
  0xcc   : > { %609 = vst [vmem:[#allocation4 + $0x10] sm:$0xff] %v593_v37 }
  0xcd   : > { %610 = vst [vmem:[#allocation4 + $0x68] sm:$0xff] %v594_v38 }
  0xce   : > { %611 = vst [vmem:[#allocation4 + $0x48] sm:$0xff] %v595_v39 }
  0xcf PF: > { %v634_v40 = vld [vmem:[#allocation2 + $0x30] sm:$0xff]  ;;  %v638_v41 = vld [vmem:[#allocation2 + $0x8] sm:$0xff]  ;;  %v635_v42 = vld [vmem:[#allocation2] sm:$0xff]  ;;  %s3375_s24 = sld [smem:[#allocation49_spill]]  ;;  %vm688_vm0 = vcmask 130048   ;;  %v2667_v32 = vstv %s527_s2  ;;  %vm1131_vm1 = vcmask 261120  }
  0xd0   : > { %v674_v43 = vpack.c.bf16 %v638_v41, %v634_v40  ;;  %v639_v44 = vld [vmem:[#allocation2 + $0x20] sm:$0xff]  ;;  %v636_v45 = vld [vmem:[#allocation2 + $0x18] sm:$0xff]  ;;  %v640_v46 = vld [vmem:[#allocation2 + $0x28] sm:$0xff]  ;;  %s787_s16 = sld [smem:[#allocation8 + %s3415_s13]]  ;;  %s1661_s25 = sshll.u32 %s2221_s21, 5 }
  0xd1   : > { %v675_v47 = vpack.c.bf16 %v639_v44, %v635_v42  ;;  %v676_v48 = vpack.c.bf16 %v640_v46, %v636_v45  ;;  %v637_v49 = vld [vmem:[#allocation2 + $0x10] sm:$0xff]  ;;  %v641_v50 = vld [vmem:[#allocation2 + $0x38] sm:$0xff]  ;;  %v618_v54 = vld [vmem:[%s2558_s1] sm:$0xff]  ;;  %s837_s18 = sld [smem:[#allocation11 + %s3415_s13]]  ;;  %s1383_s26 = sshll.u32 %s2592_s17, 4  ;;  %s1384_s26 = int_to_ptr.vmem [resolvable:$true] %s1383_s26 }
  0xd2   : > { %702 = vmatpush.bf16.msra.mxu0 %v674_v43  ;;  %v677_v52 = vpack.c.bf16 %v641_v50, %v637_v49  ;;  %v619_v55 = vld [vmem:[%s2558_s1 + $0x8] sm:$0xff]  ;;  %v2607_v56 = vld [vmem:[#allocation3] sm:$0xff]  ;;  %v2611_v59 = vld [vmem:[#allocation3 + $0x18] sm:$0xff]  ;;  %s871_s11 = sld [smem:[#allocation13 + %s3415_s13]] }
  0xd3   : > { %721 = vmatpush.bf16.msra.mxu1 %v675_v47  ;;  %740 = vmatpush.bf16.msra.mxu2 %v676_v48  ;;  %v2620_v0 = vld [vmem:[#allocation4 + $0x30] sm:$0xff]  ;;  %v2625_v3 = vld [vmem:[#allocation4] sm:$0xff]  ;;  %v621_v7 = vld [vmem:[%s2558_s1 + $0x18] sm:$0xff]  ;;  %s2716_s8 = sld [smem:[#allocation9 + %s3415_s13]] }
  0xd4   : > { %759 = vmatpush.bf16.msra.mxu3 %v677_v52  ;;  %v620_v4 = vld [vmem:[%s2558_s1 + $0x10] sm:$0xff]  ;;  %v622_v8 = vld [vmem:[%s2558_s1 + $0x20] sm:$0xff]  ;;  %v623_v12 = vld [vmem:[%s2558_s1 + $0x28] sm:$0xff]  ;;  %s2726_s2 = sld [smem:[#allocation7 + %s2221_s21]] }
  0xd5   : > { %v1673_v51 = vld [vmem:[%s3375_s24] sm:$0xff]  ;;  %v1674_v53 = vld [vmem:[%s3375_s24 + $0x8] sm:$0xff]  ;;  %v2634_v10 = vld [vmem:[#allocation3 + $0x50] sm:$0xff]  ;;  %s3389_s13 = sld [smem:[#allocation33_spill]] }
  0xd6   : > { %1638 = vmatmul.msk.bf16.vlgmr.msra.gmra.mxu0 %vm688_vm0, %v1673_v51  ;;  %1640 = vmatmul.msk.bf16.vlgmr.msra.gmra.mxu1 %vm688_vm0, %v1673_v51  ;;  %v2613_v61 = vstv %s787_s16  ;;  %v2640_v15 = vld [vmem:[#allocation3 + $0x60] sm:$0xff]  ;;  %v2642_v17 = vld [vmem:[#allocation3 + $0x68] sm:$0xff]  ;;  %v2671_v35 = vld [vmem:[#allocation4 + $0x58] sm:$0xff]  ;;  %s3392_s27 = sld [smem:[#allocation57_spill]] }
  0xd7   : > { %1642 = vmatmul.msk.bf16.vlgmr.msra.gmra.mxu2 %vm688_vm0, %v1673_v51  ;;  %1644 = vmatmul.msk.bf16.vlgmr.msra.gmra.mxu3 %vm688_vm0, %v1673_v51  ;;  %v2628_v5 = vstv %s837_s18  ;;  %v2649_v22 = vld [vmem:[#allocation3 + $0x20] sm:$0xff]  ;;  %3376 = vst [vmem:[#allocation42_spill] sm:$0xff] %v2671_v35  ;;  %v2673_v36 = vld [vmem:[#allocation4 + $0x8] sm:$0xff]  ;;  %v624_v47 = vld [vmem:[%s2558_s1 + $0x30] sm:$0xff] }
  0xd8   : > { %v2651_v24 = vstv %s871_s11  ;;  %v2659_v29 = vld [vmem:[#allocation4 + $0x40] sm:$0xff]  ;;  %v2680_v42 = vld [vmem:[#allocation4 + $0x28] sm:$0xff] }
  0xdb   : > { %s1657_s15 = sshll.u32 %s3389_s13, 2 }
  0xdc   : > { %s1380_s28 = sadd.s32 %s1661_s25, %s1657_s15 }
  0xdd   : > { %s1662_s16 = sshll.u32 %s1380_s28, 3 }
  0xde   : > { %s1401_s14 = scalar_lea.hbm %s3392_s27, %s1662_s16 }
  0xe6   : > { %1639 = vmatmul.msk.bf16.gmra.mxu0 %vm688_vm0, %v1674_v53  ;;  %1641 = vmatmul.msk.bf16.gmra.mxu1 %vm688_vm0, %v1674_v53 }
  0xe7   : > { %1643 = vmatmul.msk.bf16.gmra.mxu2 %vm688_vm0, %v1674_v53  ;;  %1645 = vmatmul.msk.bf16.gmra.mxu3 %vm688_vm0, %v1674_v53  ;;  %v625_v53 = vld [vmem:[%s2558_s1 + $0x38] sm:$0xff] }
 0x153   : > { %v704_v57 = vpop.f32.mrf.mxu0  ;;  %v723_v60 = vpop.f32.mrf.mxu1 }
 0x154   : > { %v2609_v58 = vsub.f32 %v704_v57, %v618_v54  ;;  %v2616_v62 = vsub.f32 %v723_v60, %v619_v55 }
 0x156   : > { %v788_v63 = vadd.f32 %v2609_v58, %v2607_v56  ;;  %v789_v1 = vadd.f32 %v2616_v62, %v2611_v59 }
 0x158   : > { %v805_v2 = vmul.f32 %v2613_v61, %v788_v63  ;;  %v806_v6 = vmul.f32 %v2613_v61, %v789_v1  ;;  %v2693_v63 = vld [vmem:[#allocation3 + $0x70] sm:$0xff] }
 0x15a   : > { %v821_v9 = vadd.f32 %v805_v2, %v2620_v0  ;;  %v742_v11 = vpop.f32.mrf.mxu2  ;;  %v822_v13 = vadd.f32 %v806_v6, %v2625_v3  ;;  %v761_v16 = vpop.f32.mrf.mxu3 }
 0x15b   : > { %v2638_v14 = vsub.f32 %v742_v11, %v620_v4  ;;  %v706_v18 = vpop.f32.mrf.mxu0  ;;  %v2645_v20 = vsub.f32 %v761_v16, %v621_v7  ;;  %v725_v23 = vpop.f32.mrf.mxu1 }
 0x15c   : > { %v839_v19 = vmul.f32 %v2628_v5, %v821_v9  ;;  %v2647_v21 = vsub.f32 %v706_v18, %v622_v8  ;;  %v840_v25 = vmul.f32 %v2628_v5, %v822_v13  ;;  %v2656_v27 = vsub.f32 %v725_v23, %v623_v12 }
 0x15d   : > { %v790_v26 = vadd.f32 %v2638_v14, %v2634_v10  ;;  %v791_v30 = vadd.f32 %v2645_v20, %v2640_v15 }
 0x15e   : > { %v855_v28 = vsub.f32 %v2607_v56, %v839_v19  ;;  %v792_v31 = vadd.f32 %v2647_v21, %v2642_v17  ;;  %v856_v33 = vsub.f32 %v2611_v59, %v840_v25  ;;  %v793_v37 = vadd.f32 %v2656_v27, %v2649_v22 }
 0x15f   : > { %v807_v34 = vmul.f32 %v2613_v61, %v790_v26  ;;  %v808_v40 = vmul.f32 %v2613_v61, %v791_v30 }
 0x160   : > { %v873_v38 = vsub.f32 %v855_v28, %v2651_v24  ;;  %v905_v39 = vsub.f32 0.0, %v855_v28  ;;  %v809_v41 = vmul.f32 %v2613_v61, %v792_v31  ;;  %v874_v43 = vsub.f32 %v856_v33, %v2651_v24 }
 0x161   : > { %v906_v44 = vsub.f32 0.0, %v856_v33  ;;  %v823_v45 = vadd.f32 %v807_v34, %v2659_v29  ;;  %v810_v46 = vmul.f32 %v2613_v61, %v793_v37  ;;  %v824_v50 = vadd.f32 %v808_v40, %v2671_v35 }
 0x162   : > { %v889_v48 = vmax.f32 %v873_v38, 0.0  ;;  %v921_v49 = vsub.f32 %v905_v39, %v2651_v24  ;;  %v825_v51 = vadd.f32 %v809_v41, %v2673_v36  ;;  %v744_v52 = vpop.f32.mrf.mxu2  ;;  %v890_v54 = vmax.f32 %v874_v43, 0.0  ;;  %v763_v1 = vpop.f32.mrf.mxu3 }
 0x163   : > { %v922_v55 = vsub.f32 %v906_v44, %v2651_v24  ;;  %v841_v57 = vmul.f32 %v2628_v5, %v823_v45  ;;  %v826_v60 = vadd.f32 %v810_v46, %v2680_v42  ;;  %v842_v4 = vmul.f32 %v2628_v5, %v824_v50  ;;  %v2722_v50 = vld [vmem:[#allocation4 + $0x38] sm:$0xff] }
 0x164   : > { %v937_v2 = vmax.f32 %v921_v49, 0.0  ;;  %v843_v6 = vmul.f32 %v2628_v5, %v825_v51  ;;  %v2697_v7 = vsub.f32 %v744_v52, %v624_v47  ;;  %v2701_v12 = vsub.f32 %v763_v1, %v625_v53 }
 0x165   : > { %v938_v8 = vmax.f32 %v922_v55, 0.0  ;;  %v857_v9 = vsub.f32 %v2634_v10, %v841_v57  ;;  %v844_v11 = vmul.f32 %v2628_v5, %v826_v60  ;;  %v858_v16 = vsub.f32 %v2640_v15, %v842_v4  ;;  %v2729_v55 = vld [vmem:[#allocation3 + $0x10] sm:$0xff] }
 0x166   : > { %v953_v13 = vsub.f32 %v889_v48, %v937_v2  ;;  %v859_v18 = vsub.f32 %v2642_v17, %v843_v6  ;;  %v794_v19 = vadd.f32 %v2697_v7, %v2693_v63 }
 0x167   : > { %v954_v23 = vsub.f32 %v890_v54, %v938_v8  ;;  %v875_v25 = vsub.f32 %v857_v9, %v2651_v24  ;;  %v907_v26 = vsub.f32 0.0, %v857_v9  ;;  %v860_v28 = vsub.f32 %v2649_v22, %v844_v11 }
 0x168   : > { %v969_v30 = vsub.f32 %v953_v13, %v2607_v56  ;;  %v876_v31 = vsub.f32 %v858_v16, %v2651_v24  ;;  %v908_v33 = vsub.f32 0.0, %v858_v16  ;;  %v877_v34 = vsub.f32 %v859_v18, %v2651_v24 }
 0x169   : > { %v970_v37 = vsub.f32 %v954_v23, %v2611_v59  ;;  %v891_v38 = vmax.f32 %v875_v25, 0.0  ;;  %v923_v39 = vsub.f32 %v907_v26, %v2651_v24  ;;  %v909_v40 = vsub.f32 0.0, %v859_v18 }
 0x16a   : > { %v986_v41 = vmul.f32 %v2667_v32, %v969_v30  ;;  %v892_v43 = vmax.f32 %v876_v31, 0.0  ;;  %v924_v44 = vsub.f32 %v908_v33, %v2651_v24  ;;  %v893_v45 = vmax.f32 %v877_v34, 0.0  ;;  %v2749_v31 = vld [vmem:[#allocation4 + $0x20] sm:$0xff] }
 0x16b   : > { %v987_v46 = vmul.f32 %v2667_v32, %v970_v37  ;;  %v939_v47 = vmax.f32 %v923_v39, 0.0  ;;  %v925_v48 = vsub.f32 %v909_v40, %v2651_v24  ;;  %v878_v49 = vsub.f32 %v860_v28, %v2651_v24  ;;  %3377 = vst [vmem:[#allocation43_spill] sm:$0xff] %v2749_v31  ;;  %v626_v33 = vld [vmem:[%s2558_s1 + $0x40] sm:$0xff] }
 0x16c   : > { %v1002_v51 = vadd.f32 %v986_v41, %v2607_v56  ;;  %v940_v52 = vmax.f32 %v924_v44, 0.0  ;;  %v910_v53 = vsub.f32 0.0, %v860_v28  ;;  %v811_v54 = vmul.f32 %v2613_v61, %v794_v19  ;;  %v627_v44 = vld [vmem:[%s2558_s1 + $0x48] sm:$0xff] }
 0x16d   : > { %v1003_v57 = vadd.f32 %v987_v46, %v2611_v59  ;;  %v955_v60 = vsub.f32 %v891_v38, %v939_v47  ;;  %v941_v1 = vmax.f32 %v925_v48, 0.0  ;;  %v894_v4 = vmax.f32 %v878_v49, 0.0  ;;  %v728_v38 = vpop.f32.mrf.mxu1 }
 0x16e   : > { %1267 = vst [vmem:[#allocation3] sm:$0xff] %v1002_v51  ;;  %v956_v2 = vsub.f32 %v892_v43, %v940_v52  ;;  %v926_v6 = vsub.f32 %v910_v53, %v2651_v24  ;;  %v827_v56 = vadd.f32 %v811_v54, %v2722_v50  ;;  %v795_v11 = vadd.f32 %v2701_v12, %v2729_v55 }
 0x16f   : > { %1307 = vst [vmem:[%s2592_s17] sm:$0xff] %v1002_v51  ;;  %v971_v8 = vsub.f32 %v955_v60, %v2634_v10  ;;  %v957_v9 = vsub.f32 %v893_v45, %v941_v1  ;;  %v1019_v16 = vadd.f32 %v1002_v51, %v2609_v58  ;;  %v1020_v18 = vadd.f32 %v1003_v57, %v2616_v62  ;;  %v709_v58 = vpop.f32.mrf.mxu0  ;;  %v2785_v1 = vld [vmem:[#allocation3 + $0x40] sm:$0xff] }
 0x170   : > { %1268 = vst [vmem:[#allocation3 + $0x18] sm:$0xff] %v1003_v57  ;;  %v972_v59 = vsub.f32 %v956_v2, %v2640_v15  ;;  %v942_v13 = vmax.f32 %v926_v6, 0.0  ;;  %v2745_v25 = vstv %s2716_s8  ;;  %v845_v30 = vmul.f32 %v2628_v5, %v827_v56  ;;  %v628_v2 = vld [vmem:[%s2558_s1 + $0x50] sm:$0xff]  ;;  %s3391_s8 = sld [smem:[#allocation56_spill]] }
 0x171   : > { %1308 = vst [vmem:[%s2592_s17 + $0x8] sm:$0xff] %v1003_v57  ;;  %v988_v19 = vmul.f32 %v2667_v32, %v971_v8  ;;  %v973_v23 = vsub.f32 %v957_v9, %v2642_v17  ;;  %v812_v37 = vmul.f32 %v2613_v61, %v795_v11  ;;  %v2756_v39 = vstv %s2726_s2  ;;  %v2774_v57 = vld [vmem:[#allocation3 + $0x28] sm:$0xff] }
 0x172   : > { %v989_v26 = vmul.f32 %v2667_v32, %v972_v59  ;;  %v958_v28 = vsub.f32 %v894_v4, %v942_v13  ;;  %v861_v43 = vsub.f32 %v2693_v63, %v845_v30  ;;  %v1036_v45 = vmul.f32 %v2745_v25, %v1019_v16 }
 0x173   : > { %v1004_v62 = vadd.f32 %v988_v19, %v2634_v10  ;;  %v990_v34 = vmul.f32 %v2667_v32, %v973_v23  ;;  %v1037_v46 = vmul.f32 %v2745_v25, %v1020_v18  ;;  %v828_v10 = vadd.f32 %v812_v37, %v2749_v31  ;;  %v2821_v37 = vld [vmem:[#allocation4 + $0x50] sm:$0xff] }
 0x174   : > { %v1005_v40 = vadd.f32 %v989_v26, %v2640_v15  ;;  %v974_v41 = vsub.f32 %v958_v28, %v2649_v22  ;;  %v2765_v47 = vsub.f32 %v709_v58, %v626_v33  ;;  %v911_v51 = vsub.f32 0.0, %v861_v43  ;;  %v629_v26 = vld [vmem:[%s2558_s1 + $0x58] sm:$0xff]  ;;  %v766_v28 = vpop.f32.mrf.mxu3 }
 0x175   : > { %1269 = vst [vmem:[#allocation3 + $0x50] sm:$0xff] %v1004_v62  ;;  %v1021_v48 = vadd.f32 %v1004_v62, %v2638_v14  ;;  %v1006_v52 = vadd.f32 %v990_v34, %v2642_v17  ;;  %v879_v53 = vsub.f32 %v861_v43, %v2651_v24  ;;  %v846_v54 = vmul.f32 %v2628_v5, %v828_v10  ;;  %v747_v17 = vpop.f32.mrf.mxu2  ;;  %v2819_v34 = vld [vmem:[#allocation4 + $0x78] sm:$0xff]  ;;  %v730_v10 = vpop.f32.mrf.mxu1 }
 0x176   : > { %1309 = vst [vmem:[%s2592_s17 + $0x10] sm:$0xff] %v1004_v62  ;;  %v1022_v15 = vadd.f32 %v1005_v40, %v2645_v20  ;;  %v991_v49 = vmul.f32 %v2667_v32, %v974_v41  ;;  %v2776_v60 = vsub.f32 %v728_v38, %v627_v44  ;;  %v2779_v14 = vmul.f32 %v2756_v39, %v1019_v16  ;;  %v2806_v16 = vld [vmem:[#allocation3 + $0x38] sm:$0xff]  ;;  %v2827_v44 = vld [vmem:[#allocation3 + $0x8] sm:$0xff]  ;;  %s1382_s2 = scalar_lea.hbm %s3391_s8, %s1662_s16  ;;  %s2065_s28 = scalar_lea.hbm %s3391_s8, 1536 }
 0x177   : > { %1270 = vst [vmem:[#allocation3 + $0x60] sm:$0xff] %v1005_v40  ;;  %v2782_v20 = vmul.f32 %v2756_v39, %v1020_v18  ;;  %v2789_v4 = vmul.f32 %v1036_v45, %v2667_v32  ;;  %v2792_v6 = vmul.f32 %v1037_v46, %v2667_v32  ;;  %v927_v8 = vsub.f32 %v911_v51, %v2651_v24  ;;  %v711_v45 = vpop.f32.mrf.mxu0  ;;  %v631_v46 = vld [vmem:[%s2558_s1 + $0x68] sm:$0xff]  ;;  %s1385_s9 = sshll.u32 %s1382_s2, 4  ;;  %s1386_s9 = int_to_ptr.hbm [resolvable:$true] %s1385_s9 }
 0x178   : > { %1310 = vst [vmem:[%s2592_s17 + $0x18] sm:$0xff] %v1005_v40  ;;  %v2795_v56 = vadd.f32 %v991_v49, %v2649_v22  ;;  %v1038_v9 = vmul.f32 %v2745_v25, %v1021_v48  ;;  %v2800_v11 = vmul.f32 %v2756_v39, %v1021_v48  ;;  %v862_v59 = vsub.f32 %v2729_v55, %v846_v54 }
 0x179   : > { %1271 = vst [vmem:[#allocation3 + $0x68] sm:$0xff] %v1006_v52  ;;  %v796_v13 = vadd.f32 %v2765_v47, %v2774_v57  ;;  %v895_v22 = vmax.f32 %v879_v53, 0.0  ;;  %v943_v18 = vmax.f32 %v927_v8, 0.0  ;;  %v797_v19 = vadd.f32 %v2776_v60, %v2785_v1 }
 0x17a   : > { %1311 = vst [vmem:[%s2592_s17 + $0x20] sm:$0xff] %v1006_v52  ;;  %v2811_v23 = vsub.f32 %v747_v17, %v628_v2  ;;  %v1039_v30 = vmul.f32 %v2745_v25, %v1022_v15  ;;  %v1023_v33 = vadd.f32 %v1006_v52, %v2647_v21  ;;  %v880_v58 = vsub.f32 %v862_v59, %v2651_v24  ;;  %v630_v21 = vld [vmem:[%s2558_s1 + $0x60] sm:$0xff]  ;;  %v2835_v52 = vld [vmem:[#allocation4 + $0x18] sm:$0xff] }
 0x17b   : > { %1272 = vst [vmem:[#allocation3 + $0x20] sm:$0xff] %v2795_v56  ;;  %v912_v62 = vsub.f32 0.0, %v862_v59  ;;  %v959_v38 = vsub.f32 %v895_v22, %v943_v18  ;;  %v813_v40 = vmul.f32 %v2613_v61, %v796_v13  ;;  %v814_v41 = vmul.f32 %v2613_v61, %v797_v19  ;;  %v2843_v59 = vld [vmem:[#allocation3 + $0x58] sm:$0xff] }
 0x17c   : > { %1312 = vst [vmem:[%s2592_s17 + $0x28] sm:$0xff] %v2795_v56  ;;  %v798_v43 = vadd.f32 %v2811_v23, %v2806_v16  ;;  %v2832_v48 = vmul.f32 %v2756_v39, %v1022_v15  ;;  %v896_v49 = vmax.f32 %v880_v58, 0.0  ;;  %v2837_v53 = vsub.f32 %v766_v28, %v629_v26 }
 0x17d   : > { %v928_v51 = vsub.f32 %v912_v62, %v2651_v24  ;;  %3379 = vst [vmem:[#allocation45_spill] sm:$0xff] %v2835_v52  ;;  %v975_v54 = vsub.f32 %v959_v38, %v2693_v63  ;;  %v829_v2 = vadd.f32 %v813_v40, %v2819_v34  ;;  %v830_v17 = vadd.f32 %v814_v41, %v2821_v37  ;;  %v2855_v62 = vld [vmem:[#allocation4 + $0x70] sm:$0xff]  ;;  %v2857_v38 = vld [vmem:[#allocation3 + $0x48] sm:$0xff] }
 0x17e   : > { %3378 = vst [vmem:[#allocation44_spill] sm:$0xff] %v2832_v48  ;;  %v815_v8 = vmul.f32 %v2613_v61, %v798_v43  ;;  %v799_v15 = vadd.f32 %v2837_v53, %v2827_v44  ;;  %v2847_v22 = vsub.f32 %v711_v45, %v630_v21  ;;  %v2849_v18 = vsub.f32 %v730_v10, %v631_v46 }
 0x17f   : > { %v944_v13 = vmax.f32 %v928_v51, 0.0  ;;  %v992_v19 = vmul.f32 %v2667_v32, %v975_v54  ;;  %v847_v26 = vmul.f32 %v2628_v5, %v829_v2  ;;  %v848_v28 = vmul.f32 %v2628_v5, %v830_v17  ;;  %3380 = vst [vmem:[#allocation46_spill] sm:$0xff] %v2855_v62 }
 0x180   : > { %v831_v58 = vadd.f32 %v815_v8, %v2835_v52  ;;  %v2860_v40 = vmul.f32 %v1038_v9, %v2667_v32  ;;  %v816_v43 = vmul.f32 %v2613_v61, %v799_v15  ;;  %v800_v21 = vadd.f32 %v2847_v22, %v2843_v59  ;;  %v749_v52 = vpop.f32.mrf.mxu2 }
 0x181   : > { %v960_v41 = vsub.f32 %v896_v49, %v944_v13  ;;  %v1008_v45 = vadd.f32 %v992_v19, %v2693_v63  ;;  %v863_v46 = vsub.f32 %v2774_v57, %v847_v26  ;;  %v864_v10 = vsub.f32 %v2785_v1, %v848_v28 }
 0x182   : > { %v849_v51 = vmul.f32 %v2628_v5, %v831_v58  ;;  %v1040_v54 = vmul.f32 %v2745_v25, %v1023_v33  ;;  %v832_v49 = vadd.f32 %v816_v43, %v2855_v62  ;;  %v801_v2 = vadd.f32 %v2849_v18, %v2857_v38  ;;  %v2888_v62 = vld [vmem:[#allocation4 + $0x60] sm:$0xff] }
 0x183   : > { %v976_v9 = vsub.f32 %v960_v41, %v2729_v55  ;;  %1273 = vst [vmem:[#allocation3 + $0x70] sm:$0xff] %v1008_v45  ;;  %v881_v17 = vsub.f32 %v863_v46, %v2651_v24  ;;  %v913_v8 = vsub.f32 0.0, %v863_v46  ;;  %v882_v63 = vsub.f32 %v864_v10, %v2651_v24 }
 0x184   : > { %v817_v13 = vmul.f32 %v2613_v61, %v800_v21  ;;  %1313 = vst [vmem:[%s2592_s17 + $0x30] sm:$0xff] %v1008_v45  ;;  %v914_v19 = vsub.f32 0.0, %v864_v10  ;;  %v865_v26 = vsub.f32 %v2806_v16, %v849_v51  ;;  %v850_v28 = vmul.f32 %v2628_v5, %v832_v49 }
 0x185   : > { %v993_v15 = vmul.f32 %v2667_v32, %v976_v9  ;;  %v2882_v58 = vmul.f32 %v1039_v30, %v2667_v32  ;;  %v2885_v41 = vmul.f32 %v2756_v39, %v1023_v33  ;;  %v897_v43 = vmax.f32 %v881_v17, 0.0 }
 0x186   : > { %v929_v46 = vsub.f32 %v913_v8, %v2651_v24  ;;  %v2892_v21 = vadd.f32 %v2795_v56, %v2656_v27  ;;  %v898_v51 = vmax.f32 %v882_v63, 0.0  ;;  %v930_v30 = vsub.f32 %v914_v19, %v2651_v24 }
 0x187   : > { %3381 = vst [vmem:[#allocation47_spill] sm:$0xff] %v2882_v58  ;;  %v2895_v10 = vadd.f32 %v993_v15, %v2729_v55  ;;  %v883_v33 = vsub.f32 %v865_v26, %v2651_v24  ;;  %v915_v49 = vsub.f32 0.0, %v865_v26  ;;  %v866_v17 = vsub.f32 %v2827_v44, %v850_v28  ;;  %v2910_v28 = vld [vmem:[#allocation4 + $0x10] sm:$0xff] }
 0x188   : > { %v945_v9 = vmax.f32 %v929_v46, 0.0  ;;  %v2901_v8 = vmul.f32 %v1040_v54, %v2667_v32  ;;  %v946_v27 = vmax.f32 %v930_v30, 0.0  ;;  %v833_v56 = vadd.f32 %v817_v13, %v2888_v62  ;;  %v632_v30 = vld [vmem:[%s2558_s1 + $0x70] sm:$0xff] }
 0x189   : > { %1274 = vst [vmem:[#allocation3 + $0x10] sm:$0xff] %v2895_v10  ;;  %v818_v55 = vmul.f32 %v2613_v61, %v801_v2  ;;  %v931_v15 = vsub.f32 %v915_v49, %v2651_v24  ;;  %v884_v19 = vsub.f32 %v866_v17, %v2651_v24  ;;  %v916_v26 = vsub.f32 0.0, %v866_v17 }
 0x18a   : > { %1314 = vst [vmem:[%s2592_s17 + $0x38] sm:$0xff] %v2895_v10  ;;  %v961_v63 = vsub.f32 %v897_v43, %v945_v9  ;;  %v2914_v54 = vmul.f32 %v2745_v25, %v2892_v21  ;;  %v2917_v46 = vadd.f32 %v1008_v45, %v2697_v7  ;;  %v962_v13 = vsub.f32 %v898_v51, %v946_v27  ;;  %v2926_v7 = vld [vmem:[#allocation3 + $0x78] sm:$0xff] }
 0x18b   : > { %v851_v2 = vmul.f32 %v2628_v5, %v833_v56  ;;  %v899_v9 = vmax.f32 %v883_v33, 0.0  ;;  %v947_v49 = vmax.f32 %v931_v15, 0.0  ;;  %v932_v17 = vsub.f32 %v916_v26, %v2651_v24 }
 0x18c   : > { %v977_v43 = vsub.f32 %v961_v63, %v2774_v57  ;;  %v978_v48 = vsub.f32 %v962_v13, %v2785_v1  ;;  %v900_v31 = vmax.f32 %v884_v19, 0.0  ;;  %v834_v35 = vadd.f32 %v818_v55, %v2910_v28 }
 0x18d   : > { %v867_v58 = vsub.f32 %v2843_v59, %v851_v2  ;;  %v963_v51 = vsub.f32 %v899_v9, %v947_v49  ;;  %v948_v27 = vmax.f32 %v932_v17, 0.0  ;;  %v2929_v56 = vsub.f32 %v749_v52, %v632_v30 }
 0x18e   : > { %v994_v45 = vmul.f32 %v2667_v32, %v977_v43  ;;  %v995_v33 = vmul.f32 %v2667_v32, %v978_v48  ;;  %v852_v19 = vmul.f32 %v2628_v5, %v834_v35 }
 0x18f   : > { %v885_v63 = vsub.f32 %v867_v58, %v2651_v24  ;;  %v917_v15 = vsub.f32 0.0, %v867_v58  ;;  %v979_v55 = vsub.f32 %v963_v51, %v2806_v16  ;;  %v964_v13 = vsub.f32 %v900_v31, %v948_v27 }
 0x190   : > { %v1010_v26 = vadd.f32 %v994_v45, %v2774_v57  ;;  %v802_v2 = vadd.f32 %v2929_v56, %v2926_v7  ;;  %v1011_v43 = vadd.f32 %v995_v33, %v2785_v1  ;;  %v868_v48 = vsub.f32 %v2857_v38, %v852_v19  ;;  %v2956_v33 = vld [vmem:[#allocation4 + $0x68] sm:$0xff] }
 0x191   : > { %v901_v52 = vmax.f32 %v885_v63, 0.0  ;;  %v933_v30 = vsub.f32 %v917_v15, %v2651_v24  ;;  %v996_v35 = vmul.f32 %v2667_v32, %v979_v55  ;;  %v980_v57 = vsub.f32 %v964_v13, %v2827_v44  ;;  %v633_v63 = vld [vmem:[%s2558_s1 + $0x78] sm:$0xff]  ;;  %s3388_s1 = sld [smem:[#allocation36_spill]] }
 0x192   : > { %v2942_v9 = vadd.f32 %v1010_v26, %v2765_v47  ;;  %1275 = vst [vmem:[#allocation3 + $0x28] sm:$0xff] %v1010_v26  ;;  %v819_v31 = vmul.f32 %v2613_v61, %v802_v2  ;;  %v1028_v1 = vadd.f32 %v1011_v43, %v2776_v60  ;;  %v886_v49 = vsub.f32 %v868_v48, %v2651_v24  ;;  %v768_v60 = vpop.f32.mrf.mxu3 }
 0x193   : > { %1315 = vst [vmem:[%s2592_s17 + $0x40] sm:$0xff] %v1010_v26  ;;  %v949_v58 = vmax.f32 %v933_v30, 0.0  ;;  %v918_v17 = vsub.f32 0.0, %v868_v48  ;;  %v1042_v47 = vmul.f32 %v2745_v25, %v2917_v46  ;;  %v1012_v51 = vadd.f32 %v996_v35, %v2806_v16  ;;  %v2969_v48 = vld [vmem:[#allocation3 + $0x30] sm:$0xff] }
 0x194   : > { %v1044_v45 = vmul.f32 %v2745_v25, %v2942_v9  ;;  %1276 = vst [vmem:[#allocation3 + $0x40] sm:$0xff] %v1011_v43  ;;  %v997_v27 = vmul.f32 %v2667_v32, %v980_v57  ;;  %v1026_v15 = vadd.f32 %v2895_v10, %v2701_v12  ;;  %v1045_v19 = vmul.f32 %v2745_v25, %v1028_v1 }
 0x195   : > { %1316 = vst [vmem:[%s2592_s17 + $0x48] sm:$0xff] %v1011_v43  ;;  %v965_v26 = vsub.f32 %v901_v52, %v949_v58  ;;  %v902_v55 = vmax.f32 %v886_v49, 0.0  ;;  %v2965_v16 = vadd.f32 %v1012_v51, %v2811_v23  ;;  %v934_v30 = vsub.f32 %v918_v17, %v2651_v24 }
 0x196   : > { %v1060_v13 = vmul.f32 %v1044_v45, %v2667_v32  ;;  %1277 = vst [vmem:[#allocation3 + $0x38] sm:$0xff] %v1012_v51  ;;  %v1013_v2 = vadd.f32 %v997_v27, %v2827_v44  ;;  %v2973_v12 = vmul.f32 %v2756_v39, %v2892_v21  ;;  %v835_v43 = vadd.f32 %v819_v31, %v2956_v33 }
 0x197   : > { %1317 = vst [vmem:[%s2592_s17 + $0x50] sm:$0xff] %v1012_v51  ;;  %v981_v10 = vsub.f32 %v965_v26, %v2843_v59  ;;  %v2978_v52 = vsub.f32 %v768_v60, %v633_v63  ;;  %v1057_v23 = vmul.f32 %v2914_v54, %v2667_v32  ;;  %v2984_v44 = vmul.f32 %v2756_v39, %v2917_v46  ;;  %v2999_v51 = vld [vmem:[#allocation4 + $0x48] sm:$0xff]  ;;  %s1344_s29 = sand.u32 1, %s3388_s1   ;;  %s2059_s1 = sshra.s32 %s1386_s9, 4  ;;  %s2060_s1 = int_to_ptr.hbm [resolvable:$true] %s2059_s1 }
 0x198   : > { %v1061_v35 = vmul.f32 %v1045_v19, %v2667_v32  ;;  %1278 = vst [vmem:[#allocation3 + $0x8] sm:$0xff] %v1013_v2  ;;  %v950_v57 = vmax.f32 %v934_v30, 0.0  ;;  %v853_v58 = vmul.f32 %v2628_v5, %v835_v43  ;;  %v1076_v49 = vadd.f32 %v1060_v13, %v2819_v34  ;;  %s3170_s22 = scalar_lea.sflag [#allocation24], %s1344_s29  ;;  %s2061_s3 = scalar_lea.hbm %s2060_s1, 128 }
 0x199   : > { %1318 = vst [vmem:[%s2592_s17 + $0x58] sm:$0xff] %v1013_v2  ;;  %v998_v21 = vmul.f32 %v2667_v32, %v981_v10  ;;  %v803_v31 = vadd.f32 %v2978_v52, %v2969_v48  ;;  %v2994_v54 = vmul.f32 %v1042_v47, %v2667_v32  ;;  %v1043_v46 = vmul.f32 %v2745_v25, %v1026_v15  ;;  %p2062_p8 = scmp.ne.s32.totalorder %s2060_s1, %s2061_s3  ;;  %p2066_p13 = scmp.lt.s32.totalorder %s2060_s1, %s3391_s8 }
 0x19a   : > { %v1046_v17 = vmul.f32 %v2745_v25, %v2965_v16  ;;  %v966_v45 = vsub.f32 %v902_v55, %v950_v57  ;;  %v3002_v27 = vadd.f32 %v1013_v2, %v2837_v53  ;;  %v869_v60 = vsub.f32 %v2926_v7, %v853_v58  ;;  %1291 = vst [vmem:[#allocation4 + $0x78] sm:$0xff] %v1076_v49  ;;  %p2067_p0 = scmp.lt.s32.totalorder %s2065_s28, %s2061_s3 }
 0x19b   : > { %v1014_v63 = vadd.f32 %v998_v21, %v2843_v59  ;;  %v820_v34 = vmul.f32 %v2613_v61, %v803_v31  ;;  %v3008_v47 = vmul.f32 %v2756_v39, %v1026_v15  ;;  %1331 = vst [vmem:[%s2594_s4 + $0x40] sm:$0xff] %v1076_v49  ;;  %v3013_v26 = vadd.f32 %v1061_v35, %v2821_v37  ;;  %p2063_p9 = pnand %p2062_p8, %p2433_p6 }
 0x19c   : > { %v982_v19 = vsub.f32 %v966_v45, %v2857_v38  ;;  %v1068_v53 = vadd.f32 %v2789_v4, %v2620_v0  ;;  %v887_v55 = vsub.f32 %v869_v60, %v2651_v24  ;;  %v919_v61 = vsub.f32 0.0, %v869_v60  ;;  %p2068_p2 = por %p2067_p0, %p2066_p13 }
 0x19d   : > { %v1031_v59 = vadd.f32 %v1014_v63, %v2847_v22  ;;  %1279 = vst [vmem:[#allocation3 + $0x58] sm:$0xff] %v1014_v63  ;;  %v836_v13 = vadd.f32 %v820_v34, %v2999_v51  ;;  %v1059_v15 = vmul.f32 %v1043_v46, %v2667_v32  ;;  %v1094_v2 = vmul.f32 %v2756_v39, %v2942_v9  ;;  %p2064_p12 = pneg %p2063_p9 }
 0x19e   : > { %v1095_v37 = vmul.f32 %v2756_v39, %v1028_v1  ;;  %1319 = vst [vmem:[%s2592_s17 + $0x60] sm:$0xff] %v1014_v63  ;;  %v999_v30 = vmul.f32 %v2667_v32, %v982_v19  ;;  %v3027_v0 = vmul.f32 %v1046_v17, %v2667_v32  ;;  %v3031_v4 = vmul.f32 %v2745_v25, %v3002_v27 }
 0x19f   : > { %v1048_v22 = vmul.f32 %v2745_v25, %v1031_v59  ;;  %v935_v10 = vsub.f32 %v919_v61, %v2651_v24  ;;  %1292 = vst [vmem:[#allocation4 + $0x50] sm:$0xff] %v3013_v26  ;;  %v854_v1 = vmul.f32 %v2628_v5, %v836_v13  ;;  %v1072_v43 = vadd.f32 %v2901_v8, %v2673_v36  ;;  %p2069_p3 = pnand %p2068_p2, %p2064_p12 }
 0x1a0   : > { %v1015_v9 = vadd.f32 %v999_v30, %v2857_v38  ;;  %1332 = vst [vmem:[%s2594_s4 + $0x48] sm:$0xff] %v3013_v26  ;;  %v3044_v35 = vadd.f32 %v2792_v6, %v2625_v3  ;;  %v903_v21 = vmax.f32 %v887_v55, 0.0  ;;  %v3048_v31 = vadd.f32 %v1057_v23, %v2680_v42 }
 0x1a1   : > { %v1064_v57 = vmul.f32 %v1048_v22, %v2667_v32  ;;  %v951_v58 = vmax.f32 %v935_v10, 0.0  ;;  %1283 = vst [vmem:[#allocation4 + $0x30] sm:$0xff] %v1068_v53  ;;  %v1098_v38 = vmul.f32 %v2756_v39, %v1031_v59  ;;  %v870_v46 = vsub.f32 %v2969_v48, %v854_v1  ;;  %v3385_v1 = vld [vmem:[#allocation44_spill] sm:$0xff] }
 0x1a2   : > { %v1032_v5 = vadd.f32 %v1015_v9, %v2849_v18  ;;  %1280 = vst [vmem:[#allocation3 + $0x48] sm:$0xff] %v1015_v9  ;;  %v1110_v36 = vadd.f32 %v1094_v2, %v1076_v49  ;;  %v3057_v6 = vadd.f32 %v2782_v20, %v3044_v35  ;;  %v3061_v42 = vadd.f32 %v2973_v12, %v3048_v31  ;;  %v3382_v2 = vld [vmem:[#allocation42_spill] sm:$0xff] }
 0x1a3   : > { %1320 = vst [vmem:[%s2592_s17 + $0x68] sm:$0xff] %v1015_v9  ;;  %v967_v8 = vsub.f32 %v903_v21, %v951_v58  ;;  %v1080_v3 = vadd.f32 %v1064_v57, %v2888_v62  ;;  %v888_v18 = vsub.f32 %v870_v46, %v2651_v24  ;;  %v920_v17 = vsub.f32 0.0, %v870_v46 }
 0x1a4   : > { %v1049_v23 = vmul.f32 %v2745_v25, %v1032_v5  ;;  %v1102_v49 = vadd.f32 %v2779_v14, %v1068_v53  ;;  %1287 = vst [vmem:[#allocation4 + $0x8] sm:$0xff] %v1072_v43  ;;  %v1106_v20 = vadd.f32 %v2885_v41, %v1072_v43  ;;  %v1119_v12 = vpack.c.bf16 %v3061_v42, %v3057_v6 }
 0x1a5   : > { %v983_v62 = vsub.f32 %v967_v8, %v2926_v7  ;;  %v1114_v45 = vadd.f32 %v1098_v38, %v1080_v3  ;;  %1295 = vst [vmem:[#allocation4 + $0x60] sm:$0xff] %v1080_v3  ;;  %v1099_v60 = vmul.f32 %v2756_v39, %v1032_v5  ;;  %v936_v34 = vsub.f32 %v920_v17, %v2651_v24 }
 0x1a6   : > { %v1065_v63 = vmul.f32 %v1049_v23, %v2667_v32  ;;  %1335 = vst [vmem:[%s2594_s4 + $0x60] sm:$0xff] %v1080_v3  ;;  %v3076_v14 = vadd.f32 %v2860_v40, %v2659_v29  ;;  %v904_v59 = vmax.f32 %v888_v18, 0.0  ;;  %v3082_v41 = vadd.f32 %v2994_v54, %v2722_v50  ;;  %v3383_v29 = vld [vmem:[#allocation47_spill] sm:$0xff] }
 0x1a7   : > { %v1000_v19 = vmul.f32 %v2667_v32, %v983_v62  ;;  %v1122_v55 = vpack.c.bf16 %v1114_v45, %v1110_v36  ;;  %1323 = vst [vmem:[%s2594_s4] sm:$0xff] %v1068_v53  ;;  %v952_v61 = vmax.f32 %v936_v34, 0.0  ;;  %v3092_v40 = vadd.f32 %v3383_v29, %v3382_v2 }
 0x1a8   : > { %v1081_v13 = vadd.f32 %v1065_v63, %v2910_v28  ;;  %1327 = vst [vmem:[%s2594_s4 + $0x20] sm:$0xff] %v1072_v43  ;;  %v3088_v24 = vadd.f32 %v2800_v11, %v3076_v14  ;;  %v1108_v50 = vadd.f32 %v2984_v44, %v3082_v41  ;;  %v3384_v28 = vld [vmem:[#allocation43_spill] sm:$0xff]  ;;  %v1111_v53 = vadd.f32 %v1095_v37, %v3013_v26  ;;  %v1675_v37 = vld [vmem:[%s2588_s30] sm:$0xff] }
 0x1a9   : > { %v1016_v30 = vadd.f32 %v1000_v19, %v2926_v7  ;;  %1141 = vmatpush.bf16.msrb.mxu0 %v1122_v55  ;;  %1284 = vst [vmem:[#allocation4] sm:$0xff] %v3044_v35  ;;  %v3099_v54 = vadd.f32 %v1059_v15, %v3384_v28  ;;  %v968_v11 = vsub.f32 %v904_v59, %v952_v61 }
 0x1aa   : > { %v1115_v22 = vadd.f32 %v1099_v60, %v1081_v13  ;;  %1296 = vst [vmem:[#allocation4 + $0x10] sm:$0xff] %v1081_v13  ;;  %v1118_v10 = vpack.c.bf16 %v1106_v20, %v1102_v49  ;;  %v1120_v7 = vpack.c.bf16 %v1108_v50, %v3088_v24  ;;  %v1105_v43 = vadd.f32 %v3385_v1, %v3092_v40 }
 0x1ab   : > { %v1033_v9 = vadd.f32 %v1016_v30, %v2929_v56  ;;  %1281 = vst [vmem:[#allocation3 + $0x78] sm:$0xff] %v1016_v30  ;;  %v1109_v44 = vadd.f32 %v3008_v47, %v3099_v54  ;;  %v984_v15 = vsub.f32 %v968_v11, %v2969_v48  ;;  %v3386_v56 = vld [vmem:[#allocation45_spill] sm:$0xff]  ;;  %v1063_v47 = vmul.f32 %v3031_v4, %v2667_v32 }
 0x1ac   : > { %1321 = vst [vmem:[%s2592_s17 + $0x70] sm:$0xff] %v1016_v30  ;;  %v1123_v26 = vpack.c.bf16 %v1115_v22, %v1111_v53  ;;  %v1078_v21 = vadd.f32 %v3027_v0, %v3386_v56  ;;  %v1096_v0 = vmul.f32 %v2756_v39, %v2965_v16 }
 0x1ad   : > { %v1050_v57 = vmul.f32 %v2745_v25, %v1033_v9  ;;  %1336 = vst [vmem:[%s2594_s4 + $0x68] sm:$0xff] %v1081_v13  ;;  %1142 = vmatpush.bf16.msrb.mxu0 %v1118_v10  ;;  %v1121_v58 = vpack.c.bf16 %v1109_v44, %v1105_v43  ;;  %v1001_v38 = vmul.f32 %v2667_v32, %v984_v15 }
 0x1ae   : > { %1155 = vmatpush.bf16.msrb.mxu1 %v1123_v26  ;;  %1288 = vst [vmem:[#allocation4 + $0x28] sm:$0xff] %v3048_v31  ;;  %v1100_v36 = vmul.f32 %v2756_v39, %v1033_v9 }
 0x1af   : > { %v1066_v5 = vmul.f32 %v1050_v57, %v2667_v32  ;;  %1324 = vst [vmem:[%s2594_s4 + $0x8] sm:$0xff] %v3044_v35  ;;  %v1017_v46 = vadd.f32 %v1001_v38, %v2969_v48  ;;  %v1112_v48 = vadd.f32 %v1096_v0, %v1078_v21 }
 0x1b0   : > { %1328 = vst [vmem:[%s2594_s4 + $0x28] sm:$0xff] %v3048_v31  ;;  %1650 = vmatmul.msk.bf16.vlgmr.msrb.gmra.mxu0 %vm1131_vm1, %v1675_v37  ;;  %v3387_v31 = vld [vmem:[#allocation46_spill] sm:$0xff] }
 0x1b1   : > { %v1082_v8 = vadd.f32 %v1066_v5, %v2956_v33  ;;  %1293 = vst [vmem:[#allocation4 + $0x18] sm:$0xff] %v1078_v21  ;;  %v1034_v4 = vadd.f32 %v1017_v46, %v2978_v52  ;;  %v1079_v3 = vadd.f32 %v1063_v47, %v3387_v31  ;;  %v1097_v52 = vmul.f32 %v2756_v39, %v3002_v27 }
 0x1b2   : > { %1282 = vst [vmem:[#allocation3 + $0x30] sm:$0xff] %v1017_v46  ;;  %1156 = vmatpush.bf16.msrb.mxu1 %v1119_v12 }
 0x1b3   : > { %1322 = vst [vmem:[%s2592_s17 + $0x78] sm:$0xff] %v1017_v46  ;;  %v1116_v35 = vadd.f32 %v1100_v36, %v1082_v8  ;;  %v1051_v6 = vmul.f32 %v2745_v25, %v1034_v4  ;;  %v1101_v42 = vmul.f32 %v2756_v39, %v1034_v4  ;;  %v1113_v23 = vadd.f32 %v1097_v52, %v1079_v3 }
 0x1b4   : > { %1297 = vst [vmem:[#allocation4 + $0x68] sm:$0xff] %v1082_v8 }
 0x1b5   : > { %v1124_v16 = vpack.c.bf16 %v1116_v35, %v1112_v48  ;;  %1333 = vst [vmem:[%s2594_s4 + $0x50] sm:$0xff] %v1078_v21  ;;  %1651 = vmatmul.msk.bf16.vlgmr.msrb.gmra.mxu1 %vm1131_vm1, %v1675_v37  ;;  %v1067_v33 = vmul.f32 %v1051_v6, %v2667_v32 }
 0x1b6   : > { %1337 = vst [vmem:[%s2594_s4 + $0x70] sm:$0xff] %v1082_v8 }
 0x1b7   : > { %1169 = vmatpush.bf16.msrb.mxu2 %v1124_v16  ;;  %1294 = vst [vmem:[#allocation4 + $0x70] sm:$0xff] %v1079_v3  ;;  %v1083_v25 = vadd.f32 %v1067_v33, %v2999_v51 }
 0x1b8   : > { %1334 = vst [vmem:[%s2594_s4 + $0x58] sm:$0xff] %v1079_v3 }
 0x1b9   : > { %1285 = vst [vmem:[#allocation4 + $0x40] sm:$0xff] %v3076_v14  ;;  %v1117_v18 = vadd.f32 %v1101_v42, %v1083_v25 }
 0x1ba   : > { %1298 = vst [vmem:[#allocation4 + $0x48] sm:$0xff] %v1083_v25 }
 0x1bb   : > { %1338 = vst [vmem:[%s2594_s4 + $0x78] sm:$0xff] %v1083_v25  ;;  %1170 = vmatpush.bf16.msrb.mxu2 %v1120_v7  ;;  %v1125_v32 = vpack.c.bf16 %v1117_v18, %v1113_v23 }
 0x1bc   : > { %1289 = vst [vmem:[#allocation4 + $0x38] sm:$0xff] %v3082_v41 }
 0x1bd   : > { %1325 = vst [vmem:[%s2594_s4 + $0x10] sm:$0xff] %v3076_v14  ;;  %1183 = vmatpush.bf16.msrb.mxu3 %v1125_v32 }
 0x1be   : > { %1329 = vst [vmem:[%s2594_s4 + $0x30] sm:$0xff] %v3082_v41  ;;  %1652 = vmatmul.msk.bf16.vlgmr.msrb.gmra.mxu2 %vm1131_vm1, %v1675_v37 }
 0x1bf   : > { %1286 = vst [vmem:[#allocation4 + $0x58] sm:$0xff] %v3092_v40 }
 0x1c0   : > { %1290 = vst [vmem:[#allocation4 + $0x20] sm:$0xff] %v3099_v54 }
 0x1c1   : > { %1326 = vst [vmem:[%s2594_s4 + $0x18] sm:$0xff] %v3092_v40  ;;  %1184 = vmatpush.bf16.msrb.mxu3 %v1121_v58 }
 0x1c2   : > { %1330 = vst [vmem:[%s2594_s4 + $0x38] sm:$0xff] %v3099_v54 }
 0x1c4   : > { %1653 = vmatmul.msk.bf16.vlgmr.msrb.gmra.mxu3 %vm1131_vm1, %v1675_v37 }
 0x1c5   : > { %2072 = shalt.err (!%p2069_p3)
}
 0x1c6   : > { %s2253_s10 = smov 512   ;;  %s2254_s24 = smov 1024  }
 0x1c7   : > { %s2255_s29 = smov 32   ;;  %s1404_s16 = sshll.u32 %s1401_s14, 4  ;;  %s1405_s16 = int_to_ptr.hbm [resolvable:$true] %s1404_s16 }
 0x1c8   : > { %1685 = dma.vmem_to_hbm [thread:$0]  (%p2433_p6), %s1384_s26, 2048, %s1386_s9, %s3170_s22, %s2253_s10, %s2254_s24, %s2255_s29  }
 0x1c9   : > { %s1402_s2 = sshll.u32 %s2594_s4, 4  ;;  %s2087_s3 = sshra.s32 %s1405_s16, 4  ;;  %s1403_s2 = int_to_ptr.vmem [resolvable:$true] %s1402_s2  ;;  %s2088_s3 = int_to_ptr.hbm [resolvable:$true] %s2087_s3 }
 0x1ca   : > { %s2089_s1 = scalar_lea.hbm %s2088_s3, 128  ;;  %s2093_s28 = scalar_lea.hbm %s3392_s27, 1536 }
 0x1cb   : > { %p2090_p5 = scmp.ne.s32.totalorder %s2088_s3, %s2089_s1  ;;  %p2094_p1 = scmp.lt.s32.totalorder %s2088_s3, %s3392_s27 }
 0x1cc   : > { %p2095_p4 = scmp.lt.s32.totalorder %s2093_s28, %s2089_s1 }
 0x1cd   : > { %p2091_p11 = pnand %p2090_p5, %p2433_p6 }
 0x1ce   : > { %p2096_p8 = por %p2095_p4, %p2094_p1 }
 0x1cf   : > { %p2092_p7 = pneg %p2091_p11 }
 0x1d1   : > { %p2097_p9 = pnand %p2096_p8, %p2092_p7 }
 0x1d3   : > { %2100 = shalt.err (!%p2097_p9)
}
 0x1d4   : > { %1686 = dma.vmem_to_hbm [thread:$0]  (%p2433_p6), %s1403_s2, 2048, %s1405_s16, %s3170_s22, %s2253_s10, %s2254_s24, %s2255_s29   ;;  %v1821_v49 = vld [vmem:[#allocation2 + $0x30] sm:$0xff]  ;;  %v1822_v14 = vld [vmem:[#allocation2] sm:$0xff]  ;;  %v1823_v40 = vld [vmem:[#allocation2 + $0x8] sm:$0xff] }
 0x1d5   : > { %s1191_s9 = sld [smem:[#allocation10 + %s2221_s21]]  ;;  %v1824_v7 = vld [vmem:[#allocation2 + $0x20] sm:$0xff]  ;;  %v1825_v38 = vld [vmem:[#allocation2 + $0x18] sm:$0xff]  ;;  %v1826_v6 = vld [vmem:[#allocation2 + $0x10] sm:$0xff]  ;;  %s1658_s22 = sshll.u32 %s2221_s21, 4 }
 0x1d6   : > { %s1209_s14 = sld [smem:[#allocation12 + %s2221_s21]]  ;;  %v1827_v52 = vld [vmem:[#allocation2 + $0x28] sm:$0xff]  ;;  %s1361_s4 = sadd.s32 %s1658_s22, %s1657_s15 }
 0x1d7   : > { %s1659_s21 = sshll.u32 %s1361_s4, 3  ;;  %s3393_s26 = sld [smem:[#allocation55_spill]] }
 0x1d8   : > { %s1364_s2 = sshll.u32 %s2590_s5, 4  ;;  %s1340_s1 = scalar_lea.sflag [#allocation16], %s2573_s12  ;;  %s1365_s2 = int_to_ptr.vmem [resolvable:$true] %s1364_s2 }
 0x1db   : > { %v3203_v39 = vstv %s1191_s9 }
 0x1dc   : > { %v3206_v17 = vstv %s1209_s14 }
 0x1dd   : > { %s1363_s16 = scalar_lea.hbm %s3393_s26, %s1659_s21  ;;  %s2121_s11 = scalar_lea.hbm %s3393_s26, 768 }
 0x1de   : > { %s1366_s3 = sshll.u32 %s1363_s16, 4  ;;  %s1367_s3 = int_to_ptr.hbm [resolvable:$true] %s1366_s3 }
 0x1df   : > { %s2115_s17 = sshra.s32 %s1367_s3, 4  ;;  %s2116_s17 = int_to_ptr.hbm [resolvable:$true] %s2115_s17 }
 0x1e0   : > { %s2117_s25 = scalar_lea.hbm %s2116_s17, 64  ;;  %p2122_p2 = scmp.lt.s32.totalorder %s2116_s17, %s3393_s26 }
 0x1e1   : > { %p2118_p12 = scmp.ne.s32.totalorder %s2116_s17, %s2117_s25  ;;  %p2123_p3 = scmp.lt.s32.totalorder %s2121_s11, %s2117_s25 }
 0x1e3   : > { %p2119_p13 = pnand %p2118_p12, %p2433_p6  ;;  %p2124_p5 = por %p2123_p3, %p2122_p2 }
 0x1e5   : > { %p2120_p0 = pneg %p2119_p13 }
 0x1e7   : > { %p2125_p11 = pnand %p2124_p5, %p2120_p0 }
 0x22d   : > { %v1144_v51 = vpop.f32.mrf.mxu0 }
 0x22e   : > { %v1193_v27 = vmul.f32 %v3203_v39, %v1144_v51 }
 0x230   : > { %v1201_v62 = vsub.f32 %v1821_v49, %v1193_v27 }
 0x232   : > { %v1211_v45 = vsub.f32 %v1201_v62, %v3206_v17  ;;  %v1227_v20 = vsub.f32 0.0, %v1201_v62  ;;  %v1158_v12 = vpop.f32.mrf.mxu1 }
 0x233   : > { %v1194_v63 = vmul.f32 %v3203_v39, %v1158_v12 }
 0x234   : > { %v1219_v60 = vmax.f32 %v1211_v45, 0.0  ;;  %v1235_v34 = vsub.f32 %v1227_v20, %v3206_v17 }
 0x235   : > { %v1202_v19 = vsub.f32 %v1822_v14, %v1194_v63  ;;  %v1146_v55 = vpop.f32.mrf.mxu0 }
 0x236   : > { %v1243_v59 = vmax.f32 %v1235_v34, 0.0  ;;  %v1197_v13 = vmul.f32 %v3203_v39, %v1146_v55  ;;  %v1828_v34 = vld [vmem:[#allocation2 + $0x38] sm:$0xff] }
 0x237   : > { %v1212_v41 = vsub.f32 %v1202_v19, %v3206_v17  ;;  %v1228_v61 = vsub.f32 0.0, %v1202_v19 }
 0x238   : > { %v1251_v24 = vsub.f32 %v1219_v60, %v1243_v59  ;;  %v1205_v30 = vsub.f32 %v1823_v40, %v1197_v13 }
 0x239   : > { %v1220_v2 = vmax.f32 %v1212_v41, 0.0  ;;  %v1236_v29 = vsub.f32 %v1228_v61, %v3206_v17 }
 0x23a   : > { %1259 = vst [vmem:[#allocation2 + $0x30] sm:$0xff] %v1251_v24  ;;  %v1160_v50 = vpop.f32.mrf.mxu1  ;;  %v1215_v54 = vsub.f32 %v1205_v30, %v3206_v17  ;;  %v1231_v11 = vsub.f32 0.0, %v1205_v30 }
 0x23b   : > { %1299 = vst [vmem:[%s2590_s5] sm:$0xff] %v1251_v24  ;;  %v1244_v28 = vmax.f32 %v1236_v29, 0.0  ;;  %v1198_v53 = vmul.f32 %v3203_v39, %v1160_v50 }
 0x23c   : > { %v1223_v10 = vmax.f32 %v1215_v54, 0.0  ;;  %v1239_v9 = vsub.f32 %v1231_v11, %v3206_v17 }
 0x23d   : > { %v1252_v22 = vsub.f32 %v1220_v2, %v1244_v28  ;;  %v1206_v1 = vsub.f32 %v1824_v7, %v1198_v53 }
 0x23e   : > { %v1247_v43 = vmax.f32 %v1239_v9, 0.0 }
 0x23f   : > { %1260 = vst [vmem:[#allocation2] sm:$0xff] %v1252_v22  ;;  %v1216_v44 = vsub.f32 %v1206_v1, %v3206_v17  ;;  %v1232_v15 = vsub.f32 0.0, %v1206_v1 }
 0x240   : > { %1300 = vst [vmem:[%s2590_s5 + $0x8] sm:$0xff] %v1252_v22  ;;  %v1255_v37 = vsub.f32 %v1223_v10, %v1247_v43 }
 0x241   : > { %v1172_v26 = vpop.f32.mrf.mxu2  ;;  %v1224_v57 = vmax.f32 %v1216_v44, 0.0  ;;  %v1240_v56 = vsub.f32 %v1232_v15, %v3206_v17 }
 0x242   : > { %v1195_v21 = vmul.f32 %v3203_v39, %v1172_v26  ;;  %1263 = vst [vmem:[#allocation2 + $0x8] sm:$0xff] %v1255_v37 }
 0x243   : > { %v1248_v58 = vmax.f32 %v1240_v56, 0.0  ;;  %1303 = vst [vmem:[%s2590_s5 + $0x20] sm:$0xff] %v1255_v37 }
 0x244   : > { %v1203_v47 = vsub.f32 %v1825_v38, %v1195_v21 }
 0x245   : > { %v1256_v5 = vsub.f32 %v1224_v57, %v1248_v58 }
 0x246   : > { %v1213_v46 = vsub.f32 %v1203_v47, %v3206_v17  ;;  %v1229_v0 = vsub.f32 0.0, %v1203_v47 }
 0x247   : > { %1264 = vst [vmem:[#allocation2 + $0x20] sm:$0xff] %v1256_v5  ;;  %v1186_v8 = vpop.f32.mrf.mxu3 }
 0x248   : > { %v1237_v36 = vsub.f32 %v1229_v0, %v3206_v17  ;;  %1304 = vst [vmem:[%s2590_s5 + $0x28] sm:$0xff] %v1256_v5  ;;  %v1196_v4 = vmul.f32 %v3203_v39, %v1186_v8  ;;  %v1221_v35 = vmax.f32 %v1213_v46, 0.0 }
 0x249   : > { %v1174_v48 = vpop.f32.mrf.mxu2 }
 0x24a   : > { %v1245_v31 = vmax.f32 %v1237_v36, 0.0  ;;  %v1199_v3 = vmul.f32 %v3203_v39, %v1174_v48  ;;  %v1204_v16 = vsub.f32 %v1826_v6, %v1196_v4 }
 0x24c   : > { %v1253_v33 = vsub.f32 %v1221_v35, %v1245_v31  ;;  %v1207_v42 = vsub.f32 %v1827_v52, %v1199_v3  ;;  %v1214_v25 = vsub.f32 %v1204_v16, %v3206_v17  ;;  %v1230_v23 = vsub.f32 0.0, %v1204_v16 }
 0x24e   : > { %1261 = vst [vmem:[#allocation2 + $0x18] sm:$0xff] %v1253_v33  ;;  %v1217_v18 = vsub.f32 %v1207_v42, %v3206_v17  ;;  %v1233_v32 = vsub.f32 0.0, %v1207_v42  ;;  %v1238_v51 = vsub.f32 %v1230_v23, %v3206_v17  ;;  %v1222_v62 = vmax.f32 %v1214_v25, 0.0 }
 0x24f   : > { %1301 = vst [vmem:[%s2590_s5 + $0x10] sm:$0xff] %v1253_v33  ;;  %v1188_v49 = vpop.f32.mrf.mxu3 }
 0x250   : > { %v1241_v27 = vsub.f32 %v1233_v32, %v3206_v17  ;;  %v1246_v45 = vmax.f32 %v1238_v51, 0.0  ;;  %v1200_v20 = vmul.f32 %v3203_v39, %v1188_v49  ;;  %v1225_v12 = vmax.f32 %v1217_v18, 0.0 }
 0x252   : > { %v1249_v63 = vmax.f32 %v1241_v27, 0.0  ;;  %v1254_v60 = vsub.f32 %v1222_v62, %v1246_v45  ;;  %v1208_v14 = vsub.f32 %v1828_v34, %v1200_v20 }
 0x254   : > { %v1257_v19 = vsub.f32 %v1225_v12, %v1249_v63  ;;  %1262 = vst [vmem:[#allocation2 + $0x10] sm:$0xff] %v1254_v60  ;;  %v1218_v59 = vsub.f32 %v1208_v14, %v3206_v17  ;;  %v1234_v55 = vsub.f32 0.0, %v1208_v14 }
 0x255   : > { %1302 = vst [vmem:[%s2590_s5 + $0x18] sm:$0xff] %v1254_v60 }
 0x256   : > { %1265 = vst [vmem:[#allocation2 + $0x28] sm:$0xff] %v1257_v19  ;;  %v1242_v39 = vsub.f32 %v1234_v55, %v3206_v17  ;;  %v1226_v41 = vmax.f32 %v1218_v59, 0.0 }
 0x257   : > { %1305 = vst [vmem:[%s2590_s5 + $0x30] sm:$0xff] %v1257_v19 }
 0x258   : > { %v1250_v61 = vmax.f32 %v1242_v39, 0.0 }
 0x25a   : > { %v1258_v13 = vsub.f32 %v1226_v41, %v1250_v61 }
 0x25c   : > { %1266 = vst [vmem:[#allocation2 + $0x38] sm:$0xff] %v1258_v13 }
 0x25d   : > { %1306 = vst [vmem:[%s2590_s5 + $0x38] sm:$0xff] %v1258_v13 }
 0x25e   : > { %2128 = shalt.err (!%p2125_p11)
}
 0x25f   : > { %1684 = dma.vmem_to_hbm [thread:$0]  (%p2433_p6), %s1365_s2, 1024, %s1367_s3, %s1340_s1, %s2253_s10, %s2254_s24, %s2255_s29  }
 0x260 PF: > { %s3394_s12 = sld [smem:[#allocation32_spill]]  ;;  %p1715_p7 = scmp.ge.s32.totalorder %s2237_s23, 2 }
 0x262   : > { %p1705_p1 = pnand %p1715_p7, %p2441_p10 }
 0x264   : > { %p1706_p4 = pneg %p1705_p1 }
 0x266   : > { %s1419_s22 = sand.u32 1, %s3394_s12  }
 0x267   : > { %s1420_s4 = scalar_lea.sflag [#allocation16], %s1419_s22 }
 0x268   : > { %2188 = dma.done.wait (%p1706_p4), %s1420_s4, 1024  }
 0x269   : > { %2190 = vsyncadd (%p1706_p4), %s1420_s4, 4294966272  ;;  %s3396_s21 = sadd.s32 4294967294, %s2237_s23  }
 0x26a   : > { %s1429_s13 = sand.u32 1, %s3396_s21  }
 0x26b   : > { %s1430_s30 = scalar_lea.sflag [#allocation24], %s1429_s13 }
 0x26c   : > { %2192 = dma.done.wait (%p1706_p4), %s1430_s30, 4096  }
 0x26d   : > { %2194 = vsyncadd (%p1706_p4), %s1430_s30, 4294963200  ;;  %s81_s23 = sadd.s32 1, %s2237_s23   ;;  %s3397_s10 = sld [smem:[#allocation41_spill]] }
 0x26e   : > { %p78_p6 = scmp.ge.s32.totalorder %s81_s23, 14   ;;  %s3398_s21 = sld [smem:[#allocation34_spill]] }
 0x26f   : > { %s3399_s1 = sld [smem:[#allocation35_spill]]  ;;  %s3402_s5 = smov %s2201_s6 }
 0x270   : > { %s3400_s22 = sld [smem:[#allocation39_spill]]  ;;  %s3403_s6 = smov %s2205_s7 }
 0x271   : > { %s3401_s14 = sld [smem:[#allocation40_spill]]  ;;  %s3404_s7 = smov %s2543_s0 }
 0x272   : > { %s3405_s18 = smov %s2213_s19  ;;  %s3406_s19 = smov %s2217_s20 }
 0x273   : > { %s3407_s20 = smov %s3397_s10  ;;  %80 = sbr.rel (!%p78_p6) target bundleno = 45 (0x2d), region = 143 }
 0x278   :  { %1446 = vsyncpa [#allocation15], 1 }
 0x279   :  { %1448 = vsyncpa [#allocation15 + $0x1], 1 }
 0x27a   :  { %1449 = vsyncpa [#allocation18], 1 }
 0x27b   :  { %1450 = vsyncpa [#allocation21], 1 }
 0x27c   :  { %1451 = vsyncpa [#allocation16], 1 }
 0x27d   :  { %1453 = vsyncpa [#allocation16 + $0x1], 1 }
 0x27e   :  { %1454 = vsyncpa [#allocation24], 1 }
 0x27f   :  { %1456 = vsyncpa [#allocation24 + $0x1], 1 }

</bundles_post_ra>
